<compile_context>
chip_gen: v6e
topology: v6e:2x2x1
jax: 0.10.0
libtpu: 0.0.40
codegen_flags: <defaults>
</compile_context>

<pallas_src>
import jax
import jax.numpy as jnp
from jax.experimental import pallas as pl
from jax.experimental.pallas import tpu as pltpu


def _conv1x1_kernel(x_ref, w_ref, o_ref):
    # x_ref: (HW, Cin)   bf16  activations (lane dim = Cin, dense-ish)
    # w_ref: (Cin, tco)  bf16  weight tile (lane dim = Cout tile, dense)
    # o_ref: (HW, tco)   f32   lane-dense output -> unmasked vst stores
    o_ref[...] = jnp.dot(
        x_ref[...], w_ref[...], preferred_element_type=jnp.float32
    ).astype(o_ref.dtype)


def _pick_cout_split(cout):
    # The Cout tile sits on the lane (last) axis of the weight and output
    # blocks, so it must be a multiple of 128 (or the full Cout).  A 2-way
    # split lets v7x's two TensorCores each pull half of the dominant weight
    # DMA; on single-TC v5e/v6e extra steps are pure per-step overhead, so we
    # never split more than 2 ways.  Cout=304 -> no split.
    if cout % 256 == 0:
        return 2
    return 1


def conv2d_1x1(x_nchw, weight_oihw):
    """1x1 conv, stride 1, no bias. x: (N, Cin, H, W), weight: (Cout, Cin, 1, 1)."""
    N, Cin, H, W = x_nchw.shape
    Cout = weight_oihw.shape[0]
    HW = H * W

    # Tiny wrapper-side layout prep (fused transpose+convert XLA ops):
    #   x: (N, Cin, H, W) -> (N, HW, Cin) bf16   (~357 KB read / ~179 KB write)
    #   w: (Cout, Cin, 1, 1) -> (Cin, Cout) bf16 (one-time weight prep)
    x_t = jnp.transpose(x_nchw.reshape(N, Cin, HW), (0, 2, 1)).astype(jnp.bfloat16)
    w_t = jnp.transpose(weight_oihw.reshape(Cout, Cin), (1, 0)).astype(jnp.bfloat16)

    n_co = _pick_cout_split(Cout)
    tco = Cout // n_co

    cost = pl.CostEstimate(
        flops=2 * N * HW * Cin * Cout,
        transcendentals=0,
        bytes_accessed=(N * HW * Cin * 2        # bf16 activations
                        + Cin * Cout * 2        # bf16 weight (dominant)
                        + N * HW * Cout * 4),   # f32 output
    )

    out3d = pl.pallas_call(
        _conv1x1_kernel,
        out_shape=jax.ShapeDtypeStruct((N, HW, Cout), jnp.float32),
        grid_spec=pl.GridSpec(
            # Cout-split axis leading (shards across v7x TCs when n_co == 2);
            # batch axis second.  For this module both are length 1.
            grid=(n_co, N),
            in_specs=[
                # Activations: constant along j -> stays resident in VMEM.
                pl.BlockSpec((None, HW, Cin), lambda j, n: (n, 0, 0)),
                # Weight tile: the only per-step-changing (and dominant) DMA.
                pl.BlockSpec((Cin, tco), lambda j, n: (0, j)),
            ],
            out_specs=pl.BlockSpec((None, HW, tco), lambda j, n: (n, 0, j)),
        ),
        compiler_params=pltpu.CompilerParams(
            dimension_semantics=("parallel", "parallel"),
        ),
        cost_estimate=cost,
    )(x_t, w_t)

    # Tiny (N, HW, Cout) -> (N, Cout, H, W) transpose back to NCHW (~60 KB).
    return jnp.transpose(out3d, (0, 2, 1)).reshape(N, Cout, H, W)


conv2d_1x1 = jax.jit(conv2d_1x1)


if __name__ == "__main__":
    # Shapes implied by the module: Conv2d(1824, 304, kernel=1, bias=False)
    # applied to x of shape (1, 1824, 7, 7).
    N, Cin, H, W, Cout = 1, 1824, 7, 7, 304

    key = jax.random.PRNGKey(0)
    kx, kw = jax.random.split(key)
    x = jax.random.normal(kx, (N, Cin, H, W), dtype=jnp.float32)
    weight = jax.random.normal(kw, (Cout, Cin, 1, 1), dtype=jnp.float32) * 0.02

    out = jax.block_until_ready(conv2d_1x1(x, weight))

    # Reference: same math as torch Conv2d 1x1 (f32).  The kernel feeds bf16
    # operands to the MXU with f32 accumulation, so allow ~1e-2-level error
    # over the K=1824 contraction.
    ref = jnp.einsum("nchw,oc->nohw", x, weight.reshape(Cout, Cin))
    assert out.shape == (N, Cout, H, W)
    assert out.dtype == jnp.float32
    assert jnp.allclose(out, ref, atol=5e-2, rtol=5e-2)

    print("KERNEL_OK")
</pallas_src>

<mosaic_0001>
module attributes {stable_mosaic.version = 11 : i64} {
  func.func @_conv1x1_kernel(%arg0: i32, %arg1: i32, %arg2: memref<1x49x1824xbf16, #tpu.memory_space<vmem>>, %arg3: memref<1824x304xbf16, #tpu.memory_space<vmem>>, %arg4: memref<1x49x304xf32, #tpu.memory_space<vmem>>) attributes {dimension_semantics = [#tpu.dimension_semantics<parallel>, #tpu.dimension_semantics<parallel>], iteration_bounds = array<i64: 1, 1>, scalar_prefetch = 0 : i64, scratch_operands = 0 : i64, tpu.core_type = #tpu.core_type<tc>, window_params = [{transform_indices = @transform_0, window_bounds = array<i64: 1, 49, 1824>}, {transform_indices = @transform_1, window_bounds = array<i64: 1824, 304>}, {transform_indices = @transform_2, window_bounds = array<i64: 1, 49, 304>}]} {
    %c0 = arith.constant 0 : index
    %c0_0 = arith.constant 0 : index
    %c0_1 = arith.constant 0 : index
    %0 = vector.load %arg2[%c0, %c0_0, %c0_1] : memref<1x49x1824xbf16, #tpu.memory_space<vmem>>, vector<1x49x1824xbf16>
    %1 = vector.shape_cast %0 : vector<1x49x1824xbf16> to vector<49x1824xbf16>
    %c0_2 = arith.constant 0 : index
    %c0_3 = arith.constant 0 : index
    %2 = vector.load %arg3[%c0_2, %c0_3] : memref<1824x304xbf16, #tpu.memory_space<vmem>>, vector<1824x304xbf16>
    %cst = arith.constant dense<0.000000e+00> : vector<49x304xf32>
    %3 = tpu.matmul %1, %2, %cst {dimension_numbers = #tpu.dot_dimension_numbers<[1], [0], [0], [1], [0, 0, 1, 1], [], []>} : vector<49x1824xbf16>, vector<1824x304xbf16>, vector<49x304xf32> -> vector<49x304xf32>
    %c0_4 = arith.constant 0 : index
    %c0_5 = arith.constant 0 : index
    %c0_6 = arith.constant 0 : index
    %4 = vector.load %arg4[%c0_4, %c0_5, %c0_6] : memref<1x49x304xf32, #tpu.memory_space<vmem>>, vector<1x49x304xf32>
    %5 = vector.shape_cast %4 : vector<1x49x304xf32> to vector<49x304xf32>
    %6 = vector.shape_cast %3 : vector<49x304xf32> to vector<1x49x304xf32>
    tpu.vector_store %arg4[%c0_4, %c0_5, %c0_6], %6 {strides = array<i32>} : memref<1x49x304xf32, #tpu.memory_space<vmem>>, vector<1x49x304xf32>,
    return
  }
  func.func @transform_0(%arg0: i32, %arg1: i32) -> (i32, i32, i32) {
    %c0_i32 = arith.constant 0 : i32
    %c0_i32_0 = arith.constant 0 : i32
    %c0_i32_1 = arith.constant 0 : i32
    return %arg1, %c0_i32, %c0_i32_0 : i32, i32, i32
  }
  func.func @transform_1(%arg0: i32, %arg1: i32) -> (i32, i32) {
    %c0_i32 = arith.constant 0 : i32
    %c0_i32_0 = arith.constant 0 : i32
    return %c0_i32, %arg0 : i32, i32
  }
  func.func @transform_2(%arg0: i32, %arg1: i32) -> (i32, i32, i32) {
    %c0_i32 = arith.constant 0 : i32
    %c0_i32_0 = arith.constant 0 : i32
    return %arg1, %c0_i32, %arg0 : i32, i32, i32
  }
}

</mosaic_0001>

<bundles_post_ra>
// kernel: conv2d_1x1.1
= control target key start
LH: loop header
LB: loop body
LE: loop exit
PB: predicated region body
PF: predicated region fallthrough
CT: control target
= control target key end

     0   :  { %vm2625_vm0 = vcmask 261120   ;;  %vm3720_vm1 = vcmask 392192   ;;  %vm3739_vm2 = vcmask 385024   ;;  %s6771_s1 = inlined_call_operand.vmem [shape: bf16[1824,304], index: 1, kind: input, shape index: {}]   ;;  %s6772_s0 = inlined_call_operand.vmem [shape: bf16[1,49,1824], index: 0, kind: input, shape index: {}]   ;;  %s6773_s2 = inlined_call_operand.vmem [shape: f32[1,49,304], index: 2, kind: output, shape index: {}]  }
   0x1   :  { %v4458_v0 = vld [vmem:[%s6771_s1 + $0xac] ss:$12 sps:$4 sm:$0xff]   ;;  %v4462_v2 = vld [vmem:[%s6771_s1 + $0xa8] ss:$12 sps:$4 sm:$0xff]   ;;  %v4468_v6 = vld [vmem:[%s6771_s1 + $0x90] ss:$12 sps:$4 sm:$0xff]  }
   0x2   :  { %v4460_v1 = vld [vmem:[%s6771_s1 + $0x22c] ss:$12 sps:$4 sm:$0xff]   ;;  %2638 = vmatprep.subr.bf16.mxu0 %v4458_v0  ;;  %v4463_v3 = vld [vmem:[%s6771_s1 + $0x228] ss:$12 sps:$4 sm:$0xff]   ;;  %v4469_v7 = vld [vmem:[%s6771_s1 + $0x210] ss:$12 sps:$4 sm:$0xff]  }
   0x3   :  { %2709 = vmatprep.subr.bf16.mxu1 %v4460_v1  ;;  %v4464_v4 = vld [vmem:[%s6771_s1 + $0x94] ss:$12 sps:$4 sm:$0xff]   ;;  %2639 = vmatpush1.bf16.msra.mxu0 %v4462_v2  ;;  %v4470_v8 = vld [vmem:[%s6771_s1 + $0x7c] ss:$12 sps:$4 sm:$0xff]   ;;  %v4474_v10 = vld [vmem:[%s6771_s1 + $0x78] ss:$12 sps:$4 sm:$0xff]  }
   0x4   :  { %2710 = vmatpush1.bf16.msra.mxu1 %v4463_v3  ;;  %v4466_v5 = vld [vmem:[%s6771_s1 + $0x214] ss:$12 sps:$4 sm:$0xff]   ;;  %2640 = vmatprep.subr.bf16.mxu0 %v4464_v4  ;;  %v4472_v9 = vld [vmem:[%s6771_s1 + $0x1fc] ss:$12 sps:$4 sm:$0xff]   ;;  %v4475_v11 = vld [vmem:[%s6771_s1 + $0x1f8] ss:$12 sps:$4 sm:$0xff]  }
   0x5   :  { %2711 = vmatprep.subr.bf16.mxu1 %v4466_v5  ;;  %v4476_v12 = vld [vmem:[%s6771_s1 + $0x64] ss:$12 sps:$4 sm:$0xff]   ;;  %v4480_v14 = vld [vmem:[%s6771_s1 + $0x60] ss:$12 sps:$4 sm:$0xff]   ;;  %v4486_v18 = vld [vmem:[%s6771_s1 + $0x48] ss:$12 sps:$4 sm:$0xff]  }
   0x6   :  { %v4478_v13 = vld [vmem:[%s6771_s1 + $0x1e4] ss:$12 sps:$4 sm:$0xff]   ;;  %v4481_v15 = vld [vmem:[%s6771_s1 + $0x1e0] ss:$12 sps:$4 sm:$0xff]   ;;  %v4487_v19 = vld [vmem:[%s6771_s1 + $0x1c8] ss:$12 sps:$4 sm:$0xff]  }
   0x7   :  { %2641 = vmatpush1.bf16.msra.mxu0 %v4468_v6  ;;  %v4482_v16 = vld [vmem:[%s6771_s1 + $0x4c] ss:$12 sps:$4 sm:$0xff]   ;;  %v4488_v20 = vld [vmem:[%s6771_s1 + $0x34] ss:$12 sps:$4 sm:$0xff]   ;;  %v4492_v22 = vld [vmem:[%s6771_s1 + $0x30] ss:$12 sps:$4 sm:$0xff]  }
   0x8   :  { %2712 = vmatpush1.bf16.msra.mxu1 %v4469_v7  ;;  %2642 = vmatprep.subr.bf16.mxu0 %v4470_v8  ;;  %v4484_v17 = vld [vmem:[%s6771_s1 + $0x1cc] ss:$12 sps:$4 sm:$0xff]   ;;  %v4490_v21 = vld [vmem:[%s6771_s1 + $0x1b4] ss:$12 sps:$4 sm:$0xff]   ;;  %v4493_v23 = vld [vmem:[%s6771_s1 + $0x1b0] ss:$12 sps:$4 sm:$0xff]  }
   0x9   :  { %2713 = vmatprep.subr.bf16.mxu1 %v4472_v9  ;;  %v4494_v24 = vld [vmem:[%s6771_s1 + $0x1c] ss:$12 sps:$4 sm:$0xff]   ;;  %v4498_v26 = vld [vmem:[%s6771_s1 + $0x18] ss:$12 sps:$4 sm:$0xff]   ;;  %v4504_v30 = vld [vmem:[%s6771_s1] ss:$12 sps:$4 sm:$0xff]  }
   0xa   :  { %v4496_v25 = vld [vmem:[%s6771_s1 + $0x19c] ss:$12 sps:$4 sm:$0xff]   ;;  %v4499_v27 = vld [vmem:[%s6771_s1 + $0x198] ss:$12 sps:$4 sm:$0xff]   ;;  %v4505_v31 = vld [vmem:[%s6771_s1 + $0x180] ss:$12 sps:$4 sm:$0xff]  }
   0xb   :  { %2643 = vmatpush1.bf16.msra.mxu0 %v4474_v10  ;;  %v4500_v28 = vld [vmem:[%s6771_s1 + $0x4] ss:$12 sps:$4 sm:$0xff]   ;;  %v4506_v32 = vld [vmem:[%s6771_s1 + $0x16c] ss:$12 sps:$4 sm:$0xff]   ;;  %v4510_v34 = vld [vmem:[%s6771_s1 + $0x168] ss:$12 sps:$4 sm:$0xff]  }
   0xc   :  { %2714 = vmatpush1.bf16.msra.mxu1 %v4475_v11  ;;  %2644 = vmatprep.subr.bf16.mxu0 %v4476_v12  ;;  %v4502_v29 = vld [vmem:[%s6771_s1 + $0x184] ss:$12 sps:$4 sm:$0xff]   ;;  %v4508_v33 = vld [vmem:[%s6771_s1 + $0x2ec] ss:$12 sps:$4 sm:$0xff]   ;;  %v4511_v35 = vld [vmem:[%s6771_s1 + $0x2e8] ss:$12 sps:$4 sm:$0xff]  }
   0xd   :  { %2715 = vmatprep.subr.bf16.mxu1 %v4478_v13  ;;  %v4512_v36 = vld [vmem:[%s6771_s1 + $0x154] ss:$12 sps:$4 sm:$0xff]   ;;  %v4516_v38 = vld [vmem:[%s6771_s1 + $0x150] ss:$12 sps:$4 sm:$0xff]   ;;  %v4522_v42 = vld [vmem:[%s6771_s1 + $0x138] ss:$12 sps:$4 sm:$0xff]  }
   0xe   :  { %v4514_v37 = vld [vmem:[%s6771_s1 + $0x2d4] ss:$12 sps:$4 sm:$0xff]   ;;  %v4517_v39 = vld [vmem:[%s6771_s1 + $0x2d0] ss:$12 sps:$4 sm:$0xff]   ;;  %v4523_v43 = vld [vmem:[%s6771_s1 + $0x2b8] ss:$12 sps:$4 sm:$0xff]  }
   0xf   :  { %2645 = vmatpush1.bf16.msra.mxu0 %v4480_v14  ;;  %v4518_v40 = vld [vmem:[%s6771_s1 + $0x13c] ss:$12 sps:$4 sm:$0xff]   ;;  %v4524_v44 = vld [vmem:[%s6771_s1 + $0x124] ss:$12 sps:$4 sm:$0xff]   ;;  %v4528_v46 = vld [vmem:[%s6771_s1 + $0x120] ss:$12 sps:$4 sm:$0xff]  }
  0x10   :  { %2716 = vmatpush1.bf16.msra.mxu1 %v4481_v15  ;;  %2646 = vmatprep.subr.bf16.mxu0 %v4482_v16  ;;  %v4520_v41 = vld [vmem:[%s6771_s1 + $0x2bc] ss:$12 sps:$4 sm:$0xff]   ;;  %v4526_v45 = vld [vmem:[%s6771_s1 + $0x2a4] ss:$12 sps:$4 sm:$0xff]   ;;  %v4529_v47 = vld [vmem:[%s6771_s1 + $0x2a0] ss:$12 sps:$4 sm:$0xff]  }
  0x11   :  { %2717 = vmatprep.subr.bf16.mxu1 %v4484_v17  ;;  %v4530_v48 = vld [vmem:[%s6771_s1 + $0x10c] ss:$12 sps:$4 sm:$0xff]   ;;  %v4556_v49 = vld [vmem:[%s6772_s0 + $0x4] ss:$60 sps:$4 sm:$0xff]   ;;  %v4534_v52 = vld [vmem:[%s6771_s1 + $0x108] ss:$12 sps:$4 sm:$0xff]  }
  0x12   :  { %v4532_v50 = vld [vmem:[%s6771_s1 + $0x28c] ss:$12 sps:$4 sm:$0xff]   ;;  %2670 = vmatprep.mubr.bf16.mxu0 %v4556_v49  ;;  %v4535_v53 = vld [vmem:[%s6771_s1 + $0x288] ss:$12 sps:$4 sm:$0xff]   ;;  %v4540_v56 = vld [vmem:[%s6771_s1 + $0xf0] ss:$12 sps:$4 sm:$0xff]  }
  0x13   :  { %2647 = vmatpush1.bf16.msra.mxu0 %v4486_v18  ;;  %v4559_v51 = vld [vmem:[%s6772_s0 + $0xc] ss:$60 sps:$4 sm:$0xff]   ;;  %v4536_v54 = vld [vmem:[%s6771_s1 + $0xf4] ss:$12 sps:$4 sm:$0xff]   ;;  %v4541_v57 = vld [vmem:[%s6771_s1 + $0x270] ss:$12 sps:$4 sm:$0xff]  }
  0x14   :  { %2718 = vmatpush1.bf16.msra.mxu1 %v4487_v19  ;;  %2648 = vmatprep.subr.bf16.mxu0 %v4488_v20  ;;  %v4538_v55 = vld [vmem:[%s6771_s1 + $0x274] ss:$12 sps:$4 sm:$0xff]   ;;  %v4542_v58 = vld [vmem:[%s6771_s1 + $0xdc] ss:$12 sps:$4 sm:$0xff]   ;;  %v4546_v60 = vld [vmem:[%s6771_s1 + $0xd8] ss:$12 sps:$4 sm:$0xff]  }
  0x15   :  { %2719 = vmatprep.subr.bf16.mxu1 %v4490_v21  ;;  %2741 = vmatprep.mubr.bf16.mxu1 %v4559_v51  ;;  %v4544_v59 = vld [vmem:[%s6771_s1 + $0x25c] ss:$12 sps:$4 sm:$0xff]   ;;  %v4547_v61 = vld [vmem:[%s6771_s1 + $0x258] ss:$12 sps:$4 sm:$0xff]   ;;  %v4552_v0 = vld [vmem:[%s6771_s1 + $0xc0] ss:$12 sps:$4 sm:$0xff]  }
  0x16   :  { %v4548_v62 = vld [vmem:[%s6771_s1 + $0xc4] ss:$12 sps:$4 sm:$0xff]   ;;  %v4553_v1 = vld [vmem:[%s6771_s1 + $0x240] ss:$12 sps:$4 sm:$0xff]   ;;  %v4560_v6 = vld [vmem:[%s6771_s1 + $0x3a8] ss:$12 sps:$4 sm:$0xff]  }
  0x17   :  { %2649 = vmatpush1.bf16.msra.mxu0 %v4492_v22  ;;  %v4550_v63 = vld [vmem:[%s6771_s1 + $0x244] ss:$12 sps:$4 sm:$0xff]   ;;  %v4562_v2 = vld [vmem:[%s6771_s1 + $0x3ac] ss:$12 sps:$4 sm:$0xff]   ;;  %v4554_v4 = vld [vmem:[%s6772_s0] ss:$60 sps:$4 sm:$0xff]  }
  0x18   :  { %2720 = vmatpush1.bf16.msra.mxu1 %v4493_v23  ;;  %2650 = vmatprep.subr.bf16.mxu0 %v4494_v24  ;;  %v4565_v3 = vld [vmem:[%s6771_s1 + $0x52c] ss:$12 sps:$4 sm:$0xff]   ;;  %v4557_v5 = vld [vmem:[%s6772_s0 + $0x8] ss:$60 sps:$4 sm:$0xff]   ;;  %v4568_v8 = vld [vmem:[%s6771_s1 + $0x394] ss:$12 sps:$4 sm:$0xff]  }
  0x19   :  { %2721 = vmatprep.subr.bf16.mxu1 %v4496_v25  ;;  %v4563_v7 = vld [vmem:[%s6771_s1 + $0x528] ss:$12 sps:$4 sm:$0xff]   ;;  %v4566_v10 = vld [vmem:[%s6771_s1 + $0x390] ss:$12 sps:$4 sm:$0xff]   ;;  %v4572_v14 = vld [vmem:[%s6771_s1 + $0x378] ss:$12 sps:$4 sm:$0xff]  }
  0x1a   :  { %v4571_v9 = vld [vmem:[%s6771_s1 + $0x514] ss:$12 sps:$4 sm:$0xff]   ;;  %v4569_v11 = vld [vmem:[%s6771_s1 + $0x510] ss:$12 sps:$4 sm:$0xff]   ;;  %v4575_v15 = vld [vmem:[%s6771_s1 + $0x4f8] ss:$12 sps:$4 sm:$0xff]  }
  0x1b   :  { %2651 = vmatpush1.bf16.msra.mxu0 %v4498_v26  ;;  %v4574_v12 = vld [vmem:[%s6771_s1 + $0x37c] ss:$12 sps:$4 sm:$0xff]   ;;  %v4616_v17 = vld [vmem:[%s6772_s0 + $0x84] ss:$60 sps:$4 sm:$0xff]   ;;  %v4618_v18 = vld [vmem:[%s6772_s0 + $0x78] ss:$60 sps:$4 sm:$0xff]  }
  0x1c   :  { %2722 = vmatpush1.bf16.msra.mxu1 %v4499_v27  ;;  %2652 = vmatprep.subr.bf16.mxu0 %v4500_v28  ;;  %v4577_v13 = vld [vmem:[%s6771_s1 + $0x4fc] ss:$12 sps:$4 sm:$0xff]   ;;  %v4580_v20 = vld [vmem:[%s6771_s1 + $0x364] ss:$12 sps:$4 sm:$0xff]   ;;  %v4578_v22 = vld [vmem:[%s6771_s1 + $0x360] ss:$12 sps:$4 sm:$0xff]  }
  0x1d   :  { %2723 = vmatprep.subr.bf16.mxu1 %v4502_v29  ;;  %v4614_v16 = vld [vmem:[%s6772_s0 + $0x7c] ss:$60 sps:$4 sm:$0xff]   ;;  %v4583_v21 = vld [vmem:[%s6771_s1 + $0x4e4] ss:$12 sps:$4 sm:$0xff]   ;;  %v4581_v23 = vld [vmem:[%s6771_s1 + $0x4e0] ss:$12 sps:$4 sm:$0xff]  }
  0x1e   :  { %v4619_v19 = vld [vmem:[%s6772_s0 + $0x80] ss:$60 sps:$4 sm:$0xff]   ;;  %v4586_v24 = vld [vmem:[%s6771_s1 + $0x34c] ss:$12 sps:$4 sm:$0xff]   ;;  %v4584_v26 = vld [vmem:[%s6771_s1 + $0x348] ss:$12 sps:$4 sm:$0xff]  }
  0x1f   :  { %2653 = vmatpush1.bf16.msra.mxu0 %v4504_v30  ;;  %v4589_v25 = vld [vmem:[%s6771_s1 + $0x4cc] ss:$12 sps:$4 sm:$0xff]   ;;  %v4587_v27 = vld [vmem:[%s6771_s1 + $0x4c8] ss:$12 sps:$4 sm:$0xff]  }
  0x20   :  { %2724 = vmatpush1.bf16.msra.mxu1 %v4505_v31  ;;  %2654 = vmatprep.subr.bf16.mxu0 %v4506_v32  ;;  %v4632_v28 = vld [vmem:[%s6772_s0 + $0xf4] ss:$60 sps:$4 sm:$0xff]   ;;  %v4634_v29 = vld [vmem:[%s6772_s0 + $0xfc] ss:$60 sps:$4 sm:$0xff]   ;;  %v4605_v49 = vld [vmem:[%s6771_s1 + $0x480] ss:$12 sps:$4 sm:$0xff]  }
  0x21   :  { %2725 = vmatprep.subr.bf16.mxu1 %v4508_v33  ;;  %v4636_v30 = vld [vmem:[%s6772_s0 + $0xf0] ss:$60 sps:$4 sm:$0xff]   ;;  %v4637_v31 = vld [vmem:[%s6772_s0 + $0xf8] ss:$60 sps:$4 sm:$0xff]  }
  0x22   :  { %v4592_v32 = vld [vmem:[%s6771_s1 + $0x334] ss:$12 sps:$4 sm:$0xff]   ;;  %v4613_v51 = vld [vmem:[%s6771_s1 + $0x5ec] ss:$12 sps:$4 sm:$0xff]  }
  0x23   :  { %2655 = vmatpush2.bf16.msra.mxu0 %v4510_v34  ;;  %v4595_v33 = vld [vmem:[%s6771_s1 + $0x4b4] ss:$12 sps:$4 sm:$0xff]   ;;  %v4590_v34 = vld [vmem:[%s6771_s1 + $0x330] ss:$12 sps:$4 sm:$0xff]  }
  0x24   :  { %2726 = vmatpush2.bf16.msra.mxu1 %v4511_v35  ;;  %2656 = vmatprep.subr.bf16.mxu0 %v4512_v36  ;;  %v4593_v35 = vld [vmem:[%s6771_s1 + $0x4b0] ss:$12 sps:$4 sm:$0xff]  }
  0x25   :  { %2727 = vmatprep.subr.bf16.mxu1 %v4514_v37  ;;  %v4598_v36 = vld [vmem:[%s6771_s1 + $0x31c] ss:$12 sps:$4 sm:$0xff]  }
  0x26   :  { %v4601_v37 = vld [vmem:[%s6771_s1 + $0x49c] ss:$12 sps:$4 sm:$0xff]  }
  0x27   :  { %2657 = vmatpush2.bf16.msra.mxu0 %v4516_v38  ;;  %v60_v38 = vld [vmem:[%s6772_s0 + $0x168] sm:$0x11] }
  0x28   :  { %2728 = vmatpush2.bf16.msra.mxu1 %v4517_v39  ;;  %2658 = vmatprep.subr.bf16.mxu0 %v4518_v40  ;;  %v61_v39 = vld [vmem:[%s6772_s0 + $0x170] sm:$0x11]  ;;  %v5364_v40 = vcombine.high %v60_v38, %v60_v38 }
  0x29   :  { %2729 = vmatprep.subr.bf16.mxu1 %v4520_v41  ;;  %v5366_v41 = vcombine.high %v61_v39, %v61_v39 }
  0x2b   :  { %2659 = vmatpush2.bf16.msra.mxu0 %v4522_v42  ;;  %v5368_v42 = vcombine.low %v60_v38, %v60_v38  ;;  %v4704_v38 = vld [vmem:[%s6771_s1 + $0x664] ss:$12 sps:$4 sm:$0xff]  }
  0x2c   :  { %2730 = vmatpush2.bf16.msra.mxu1 %v4523_v43  ;;  %2660 = vmatprep.subr.bf16.mxu0 %v4524_v44  ;;  %v5370_v43 = vcombine.low %v61_v39, %v61_v39  ;;  %v4596_v44 = vld [vmem:[%s6771_s1 + $0x318] ss:$12 sps:$4 sm:$0xff]  }
  0x2d   :  { %2731 = vmatprep.subr.bf16.mxu1 %v4526_v45  ;;  %v4599_v45 = vld [vmem:[%s6771_s1 + $0x498] ss:$12 sps:$4 sm:$0xff]  }
  0x2e   :  { %v4707_v39 = vld [vmem:[%s6771_s1 + $0x7e4] ss:$12 sps:$4 sm:$0xff]  }
  0x2f   :  { %2661 = vmatpush2.bf16.msra.mxu0 %v4528_v46  ;;  %v4604_v46 = vld [vmem:[%s6771_s1 + $0x304] ss:$12 sps:$4 sm:$0xff]  }
  0x30   :  { %2732 = vmatpush2.bf16.msra.mxu1 %v4529_v47  ;;  %2662 = vmatprep.subr.bf16.mxu0 %v4530_v48  ;;  %v4607_v47 = vld [vmem:[%s6771_s1 + $0x484] ss:$12 sps:$4 sm:$0xff]   ;;  %v4602_v48 = vld [vmem:[%s6771_s1 + $0x300] ss:$12 sps:$4 sm:$0xff]  }
  0x31   :  { %2733 = vmatprep.subr.bf16.mxu1 %v4532_v50  ;;  %v4610_v50 = vld [vmem:[%s6771_s1 + $0x46c] ss:$12 sps:$4 sm:$0xff]  }
  0x33   :  { %2663 = vmatpush2.bf16.msra.mxu0 %v4534_v52  ;;  %v4608_v52 = vld [vmem:[%s6771_s1 + $0x468] ss:$12 sps:$4 sm:$0xff]  }
  0x34   :  { %2734 = vmatpush2.bf16.msra.mxu1 %v4535_v53  ;;  %2664 = vmatprep.subr.bf16.mxu0 %v4536_v54  ;;  %v4674_v53 = vld [vmem:[%s6772_s0 + $0x14] ss:$60 sps:$4 sm:$0xff]  }
  0x35   :  { %2735 = vmatprep.subr.bf16.mxu1 %v4538_v55  ;;  %v4611_v54 = vld [vmem:[%s6771_s1 + $0x5e8] ss:$12 sps:$4 sm:$0xff]   ;;  %v4677_v55 = vld [vmem:[%s6772_s0 + $0x1c] ss:$60 sps:$4 sm:$0xff]  }
  0x37   :  { %2665 = vmatpush2.bf16.msra.mxu0 %v4540_v56  ;;  %v4622_v56 = vld [vmem:[%s6771_s1 + $0x454] ss:$12 sps:$4 sm:$0xff]  }
  0x38   :  { %2736 = vmatpush2.bf16.msra.mxu1 %v4541_v57  ;;  %2666 = vmatprep.subr.bf16.mxu0 %v4542_v58  ;;  %v4625_v57 = vld [vmem:[%s6771_s1 + $0x5d4] ss:$12 sps:$4 sm:$0xff]   ;;  %v4620_v58 = vld [vmem:[%s6771_s1 + $0x450] ss:$12 sps:$4 sm:$0xff]  }
  0x39   :  { %2737 = vmatprep.subr.bf16.mxu1 %v4544_v59  ;;  %v4623_v59 = vld [vmem:[%s6771_s1 + $0x5d0] ss:$12 sps:$4 sm:$0xff]  }
  0x3b   :  { %2667 = vmatpush2.bf16.msra.mxu0 %v4546_v60  ;;  %v4628_v60 = vld [vmem:[%s6771_s1 + $0x43c] ss:$12 sps:$4 sm:$0xff]  }
  0x3c   :  { %2738 = vmatpush2.bf16.msra.mxu1 %v4547_v61  ;;  %2668 = vmatprep.subr.bf16.mxu0 %v4548_v62  ;;  %v4631_v61 = vld [vmem:[%s6771_s1 + $0x5bc] ss:$12 sps:$4 sm:$0xff]   ;;  %v4626_v62 = vld [vmem:[%s6771_s1 + $0x438] ss:$12 sps:$4 sm:$0xff]  }
  0x3d   :  { %2739 = vmatprep.subr.bf16.mxu1 %v4550_v63  ;;  %v4629_v63 = vld [vmem:[%s6771_s1 + $0x5b8] ss:$12 sps:$4 sm:$0xff]  }
  0x3f   :  { %2669 = vmatpush2.bf16.msra.mxu0 %v4552_v0  ;;  %v4640_v0 = vld [vmem:[%s6771_s1 + $0x424] ss:$12 sps:$4 sm:$0xff]  }
  0x40   :  { %2740 = vmatpush2.bf16.msra.mxu1 %v4553_v1  ;;  %2780 = vmatprep.subr.bf16.mxu0 %v4562_v2  ;;  %v4643_v1 = vld [vmem:[%s6771_s1 + $0x5a4] ss:$12 sps:$4 sm:$0xff]   ;;  %v4638_v2 = vld [vmem:[%s6771_s1 + $0x420] ss:$12 sps:$4 sm:$0xff]  }
  0x41   :  { %2851 = vmatprep.subr.bf16.mxu1 %v4565_v3  ;;  %v4641_v3 = vld [vmem:[%s6771_s1 + $0x5a0] ss:$12 sps:$4 sm:$0xff]  }
  0x42   :  { %2671 = vmatmul.mubr.bf16.vlgmr.msra.gmra.mxu0 %v4554_v4  ;;  %v4646_v4 = vld [vmem:[%s6771_s1 + $0x40c] ss:$12 sps:$4 sm:$0xff]  }
  0x43   :  { %2742 = vmatmul.mubr.bf16.vlgmr.msra.gmra.mxu1 %v4557_v5  ;;  %2781 = vmatpush1.bf16.msra.mxu0 %v4560_v6  ;;  %v4649_v5 = vld [vmem:[%s6771_s1 + $0x58c] ss:$12 sps:$4 sm:$0xff]   ;;  %v4644_v6 = vld [vmem:[%s6771_s1 + $0x408] ss:$12 sps:$4 sm:$0xff]  }
  0x44   :  { %2852 = vmatpush1.bf16.msra.mxu1 %v4563_v7  ;;  %2782 = vmatprep.subr.bf16.mxu0 %v4568_v8  ;;  %v4647_v7 = vld [vmem:[%s6771_s1 + $0x588] ss:$12 sps:$4 sm:$0xff]  }
  0x45   :  { %2853 = vmatprep.subr.bf16.mxu1 %v4571_v9  ;;  %2680 = vmatprep.mubr.bf16.mxu0 %v4614_v16  ;;  %v4656_v8 = vld [vmem:[%s6771_s1 + $0x3f4] ss:$12 sps:$4 sm:$0xff]   ;;  %v4668_v16 = vld [vmem:[%s6771_s1 + $0x3c4] ss:$12 sps:$4 sm:$0xff]  }
  0x46   :  { %2751 = vmatprep.mubr.bf16.mxu1 %v4616_v17  ;;  %v4659_v9 = vld [vmem:[%s6771_s1 + $0x574] ss:$12 sps:$4 sm:$0xff]   ;;  %v4671_v17 = vld [vmem:[%s6771_s1 + $0x544] ss:$12 sps:$4 sm:$0xff]  }
  0x47   :  { %2783 = vmatpush1.bf16.msra.mxu0 %v4566_v10  ;;  %v4654_v10 = vld [vmem:[%s6771_s1 + $0x3f0] ss:$12 sps:$4 sm:$0xff]  }
  0x48   :  { %2854 = vmatpush1.bf16.msra.mxu1 %v4569_v11  ;;  %2784 = vmatprep.subr.bf16.mxu0 %v4574_v12  ;;  %v4657_v11 = vld [vmem:[%s6771_s1 + $0x570] ss:$12 sps:$4 sm:$0xff]  }
  0x49   :  { %2855 = vmatprep.subr.bf16.mxu1 %v4577_v13  ;;  %v4662_v12 = vld [vmem:[%s6771_s1 + $0x3dc] ss:$12 sps:$4 sm:$0xff]  }
  0x4a   :  { %2681 = vmatmul.mubr.bf16.gmra.mxu0 %v4618_v18  ;;  %v4665_v13 = vld [vmem:[%s6771_s1 + $0x55c] ss:$12 sps:$4 sm:$0xff]   ;;  %v4666_v18 = vld [vmem:[%s6771_s1 + $0x3c0] ss:$12 sps:$4 sm:$0xff]  }
  0x4b   :  { %2752 = vmatmul.mubr.bf16.gmra.mxu1 %v4619_v19  ;;  %2785 = vmatpush1.bf16.msra.mxu0 %v4572_v14  ;;  %v4660_v14 = vld [vmem:[%s6771_s1 + $0x3d8] ss:$12 sps:$4 sm:$0xff]   ;;  %v4669_v19 = vld [vmem:[%s6771_s1 + $0x540] ss:$12 sps:$4 sm:$0xff]  }
  0x4c   :  { %2856 = vmatpush1.bf16.msra.mxu1 %v4575_v15  ;;  %2786 = vmatprep.subr.bf16.mxu0 %v4580_v20  ;;  %v4663_v15 = vld [vmem:[%s6771_s1 + $0x558] ss:$12 sps:$4 sm:$0xff]  }
  0x4d   :  { %2857 = vmatprep.subr.bf16.mxu1 %v4583_v21  ;;  %2690 = vmatprep.mubr.bf16.mxu0 %v4632_v28  ;;  %v4680_v20 = vld [vmem:[%s6771_s1 + $0x6ac] ss:$12 sps:$4 sm:$0xff]  }
  0x4e   :  { %2761 = vmatprep.mubr.bf16.mxu1 %v4634_v29  ;;  %v4683_v21 = vld [vmem:[%s6771_s1 + $0x82c] ss:$12 sps:$4 sm:$0xff]   ;;  %v4699_v29 = vld [vmem:[%s6772_s0 + $0x94] ss:$60 sps:$4 sm:$0xff]  }
  0x4f   :  { %2787 = vmatpush1.bf16.msra.mxu0 %v4578_v22  ;;  %v4672_v22 = vld [vmem:[%s6772_s0 + $0x10] ss:$60 sps:$4 sm:$0xff]  }
  0x50   :  { %2858 = vmatpush1.bf16.msra.mxu1 %v4581_v23  ;;  %2788 = vmatprep.subr.bf16.mxu0 %v4586_v24  ;;  %v4675_v23 = vld [vmem:[%s6772_s0 + $0x18] ss:$60 sps:$4 sm:$0xff]   ;;  %v4690_v28 = vld [vmem:[%s6772_s0 + $0x8c] ss:$60 sps:$4 sm:$0xff]  }
  0x51   :  { %2859 = vmatprep.subr.bf16.mxu1 %v4589_v25  ;;  %v4678_v24 = vld [vmem:[%s6771_s1 + $0x6a8] ss:$12 sps:$4 sm:$0xff]  }
  0x52   :  { %2691 = vmatmul.mubr.bf16.gmra.mxu0 %v4636_v30  ;;  %v4681_v25 = vld [vmem:[%s6771_s1 + $0x828] ss:$12 sps:$4 sm:$0xff]   ;;  %v4684_v30 = vld [vmem:[%s6771_s1 + $0x690] ss:$12 sps:$4 sm:$0xff]  }
  0x53   :  { %2762 = vmatmul.mubr.bf16.gmra.mxu1 %v4637_v31  ;;  %2789 = vmatpush1.bf16.msra.mxu0 %v4584_v26  ;;  %v4686_v26 = vld [vmem:[%s6771_s1 + $0x694] ss:$12 sps:$4 sm:$0xff]   ;;  %v4687_v31 = vld [vmem:[%s6771_s1 + $0x810] ss:$12 sps:$4 sm:$0xff]  }
  0x54   :  { %2860 = vmatpush1.bf16.msra.mxu1 %v4587_v27  ;;  %2790 = vmatprep.subr.bf16.mxu0 %v4592_v32  ;;  %v4689_v27 = vld [vmem:[%s6771_s1 + $0x814] ss:$12 sps:$4 sm:$0xff]   ;;  %v4695_v32 = vld [vmem:[%s6771_s1 + $0x67c] ss:$12 sps:$4 sm:$0xff]  }
  0x55   :  { %2861 = vmatprep.subr.bf16.mxu1 %v4595_v33  ;;  %2700 = vmatprep.mubr.bf16.mxu0 %v5364_v40  ;;  %v4698_v33 = vld [vmem:[%s6771_s1 + $0x7fc] ss:$12 sps:$4 sm:$0xff]  }
  0x56   :  { %2771 = vmatprep.mubr.bf16.mxu1 %v5366_v41 }
  0x57   :  { %2791 = vmatpush1.bf16.msra.mxu0 %v4590_v34  ;;  %v4692_v34 = vld [vmem:[%s6772_s0 + $0x88] ss:$60 sps:$4 sm:$0xff]  }
  0x58   :  { %2862 = vmatpush1.bf16.msra.mxu1 %v4593_v35  ;;  %2792 = vmatprep.subr.bf16.mxu0 %v4598_v36  ;;  %v4693_v35 = vld [vmem:[%s6771_s1 + $0x678] ss:$12 sps:$4 sm:$0xff]  }
  0x59   :  { %2863 = vmatprep.subr.bf16.mxu1 %v4601_v37  ;;  %v4696_v36 = vld [vmem:[%s6771_s1 + $0x7f8] ss:$12 sps:$4 sm:$0xff]   ;;  %v4701_v37 = vld [vmem:[%s6772_s0 + $0x90] ss:$60 sps:$4 sm:$0xff]  }
  0x5a   :  { %2701 = vmatmul.mubr.bf16.gmra.mxu0 %v5368_v42 }
  0x5b   :  { %2772 = vmatmul.mubr.bf16.gmra.mxu1 %v5370_v43  ;;  %2793 = vmatpush1.bf16.msra.mxu0 %v4596_v44  ;;  %v4708_v44 = vld [vmem:[%s6772_s0 + $0x104] ss:$60 sps:$4 sm:$0xff]  }
  0x5c   :  { %2864 = vmatpush1.bf16.msra.mxu1 %v4599_v45  ;;  %2794 = vmatprep.subr.bf16.mxu0 %v4604_v46  ;;  %v4717_v45 = vld [vmem:[%s6772_s0 + $0x10c] ss:$60 sps:$4 sm:$0xff]  }
  0x5d   :  { %2865 = vmatprep.subr.bf16.mxu1 %v4607_v47  ;;  %2812 = vmatprep.mubr.bf16.mxu0 %v4674_v53  ;;  %v4702_v46 = vld [vmem:[%s6771_s1 + $0x660] ss:$12 sps:$4 sm:$0xff]   ;;  %v4719_v53 = vld [vmem:[%s6772_s0 + $0x108] ss:$60 sps:$4 sm:$0xff]  }
  0x5e   :  { %2883 = vmatprep.mubr.bf16.mxu1 %v4677_v55  ;;  %v4705_v47 = vld [vmem:[%s6771_s1 + $0x7e0] ss:$12 sps:$4 sm:$0xff]  }
  0x5f   :  { %2795 = vmatpush1.bf16.msra.mxu0 %v4602_v48  ;;  %v4713_v48 = vld [vmem:[%s6771_s1 + $0x64c] ss:$12 sps:$4 sm:$0xff]   ;;  %v63_v55 = vld [vmem:[%s6772_s0 + $0x180] sm:$0x11] }
  0x60   :  { %2866 = vmatpush1.bf16.msra.mxu1 %v4605_v49  ;;  %2796 = vmatprep.subr.bf16.mxu0 %v4610_v50  ;;  %v4710_v49 = vld [vmem:[%s6772_s0 + $0x100] ss:$60 sps:$4 sm:$0xff]   ;;  %v4716_v50 = vld [vmem:[%s6771_s1 + $0x7cc] ss:$12 sps:$4 sm:$0xff]  }
  0x61   :  { %2867 = vmatprep.subr.bf16.mxu1 %v4613_v51  ;;  %v4711_v51 = vld [vmem:[%s6771_s1 + $0x648] ss:$12 sps:$4 sm:$0xff]  }
  0x63   :  { %2797 = vmatpush2.bf16.msra.mxu0 %v4608_v52  ;;  %v4714_v52 = vld [vmem:[%s6771_s1 + $0x7c8] ss:$12 sps:$4 sm:$0xff]  }
  0x64   :  { %2868 = vmatpush2.bf16.msra.mxu1 %v4611_v54  ;;  %2798 = vmatprep.subr.bf16.mxu0 %v4622_v56  ;;  %v62_v54 = vld [vmem:[%s6772_s0 + $0x178] sm:$0x11]  ;;  %v4722_v56 = vld [vmem:[%s6771_s1 + $0x634] ss:$12 sps:$4 sm:$0xff]  }
  0x65   :  { %2869 = vmatprep.subr.bf16.mxu1 %v4625_v57  ;;  %v4725_v57 = vld [vmem:[%s6771_s1 + $0x7b4] ss:$12 sps:$4 sm:$0xff]  }
  0x67   :  { %2799 = vmatpush2.bf16.msra.mxu0 %v4620_v58  ;;  %v5598_v58 = vcombine.high %v62_v54, %v62_v54 }
  0x68   :  { %2870 = vmatpush2.bf16.msra.mxu1 %v4623_v59  ;;  %2800 = vmatprep.subr.bf16.mxu0 %v4628_v60  ;;  %v5600_v59 = vcombine.high %v63_v55, %v63_v55  ;;  %v4720_v60 = vld [vmem:[%s6771_s1 + $0x630] ss:$12 sps:$4 sm:$0xff]  }
  0x69   :  { %2871 = vmatprep.subr.bf16.mxu1 %v4631_v61  ;;  %v4723_v61 = vld [vmem:[%s6771_s1 + $0x7b0] ss:$12 sps:$4 sm:$0xff]  }
  0x6b   :  { %2801 = vmatpush2.bf16.msra.mxu0 %v4626_v62  ;;  %v4730_v62 = vld [vmem:[%s6771_s1 + $0x61c] ss:$12 sps:$4 sm:$0xff]  }
  0x6c   :  { %2872 = vmatpush2.bf16.msra.mxu1 %v4629_v63  ;;  %2802 = vmatprep.subr.bf16.mxu0 %v4640_v0  ;;  %v4733_v63 = vld [vmem:[%s6771_s1 + $0x79c] ss:$12 sps:$4 sm:$0xff]   ;;  %v5616_v0 = vcombine.low %v62_v54, %v62_v54  ;;  %v4807_v54 = vld [vmem:[%s6772_s0 + $0xa4] ss:$60 sps:$4 sm:$0xff]  }
  0x6d   :  { %2873 = vmatprep.subr.bf16.mxu1 %v4643_v1  ;;  %v4728_v1 = vld [vmem:[%s6771_s1 + $0x618] ss:$12 sps:$4 sm:$0xff]  }
  0x6f   :  { %2803 = vmatpush2.bf16.msra.mxu0 %v4638_v2  ;;  %v4731_v2 = vld [vmem:[%s6771_s1 + $0x798] ss:$12 sps:$4 sm:$0xff]  }
  0x70   :  { %2874 = vmatpush2.bf16.msra.mxu1 %v4641_v3  ;;  %2804 = vmatprep.subr.bf16.mxu0 %v4646_v4  ;;  %v5624_v3 = vcombine.low %v63_v55, %v63_v55  ;;  %v4738_v4 = vld [vmem:[%s6771_s1 + $0x604] ss:$12 sps:$4 sm:$0xff]  }
  0x71   :  { %2875 = vmatprep.subr.bf16.mxu1 %v4649_v5  ;;  %v4741_v5 = vld [vmem:[%s6771_s1 + $0x784] ss:$12 sps:$4 sm:$0xff]  }
  0x72   :  { %v4828_v55 = vld [vmem:[%s6771_s1 + $0xa84] ss:$12 sps:$4 sm:$0xff]  }
  0x73   :  { %2805 = vmatpush2.bf16.msra.mxu0 %v4644_v6  ;;  %v4792_v6 = vld [vmem:[%s6772_s0 + $0x24] ss:$60 sps:$4 sm:$0xff]  }
  0x74   :  { %2876 = vmatpush2.bf16.msra.mxu1 %v4647_v7  ;;  %2806 = vmatprep.subr.bf16.mxu0 %v4656_v8  ;;  %v4795_v7 = vld [vmem:[%s6772_s0 + $0x2c] ss:$60 sps:$4 sm:$0xff]  }
  0x75   :  { %2877 = vmatprep.subr.bf16.mxu1 %v4659_v9  ;;  %v4736_v8 = vld [vmem:[%s6771_s1 + $0x600] ss:$12 sps:$4 sm:$0xff]  }
  0x76   :  { %v4739_v9 = vld [vmem:[%s6771_s1 + $0x780] ss:$12 sps:$4 sm:$0xff]  }
  0x77   :  { %2807 = vmatpush2.bf16.msra.mxu0 %v4654_v10  ;;  %v4744_v10 = vld [vmem:[%s6771_s1 + $0x76c] ss:$12 sps:$4 sm:$0xff]  }
  0x78   :  { %2878 = vmatpush2.bf16.msra.mxu1 %v4657_v11  ;;  %2808 = vmatprep.subr.bf16.mxu0 %v4662_v12  ;;  %v4747_v11 = vld [vmem:[%s6771_s1 + $0x8ec] ss:$12 sps:$4 sm:$0xff]   ;;  %v4742_v12 = vld [vmem:[%s6771_s1 + $0x768] ss:$12 sps:$4 sm:$0xff]  }
  0x79   :  { %2879 = vmatprep.subr.bf16.mxu1 %v4665_v13  ;;  %v4745_v13 = vld [vmem:[%s6771_s1 + $0x8e8] ss:$12 sps:$4 sm:$0xff]  }
  0x7b   :  { %2809 = vmatpush2.bf16.msra.mxu0 %v4660_v14  ;;  %v4750_v14 = vld [vmem:[%s6771_s1 + $0x754] ss:$12 sps:$4 sm:$0xff]  }
  0x7c   :  { %2880 = vmatpush2.bf16.msra.mxu1 %v4663_v15  ;;  %2810 = vmatprep.subr.bf16.mxu0 %v4668_v16  ;;  %v4753_v15 = vld [vmem:[%s6771_s1 + $0x8d4] ss:$12 sps:$4 sm:$0xff]   ;;  %v4748_v16 = vld [vmem:[%s6771_s1 + $0x750] ss:$12 sps:$4 sm:$0xff]  }
  0x7d   :  { %2881 = vmatprep.subr.bf16.mxu1 %v4671_v17  ;;  %v4751_v17 = vld [vmem:[%s6771_s1 + $0x8d0] ss:$12 sps:$4 sm:$0xff]  }
  0x7f   :  { %2811 = vmatpush2.bf16.msra.mxu0 %v4666_v18  ;;  %v4756_v18 = vld [vmem:[%s6771_s1 + $0x73c] ss:$12 sps:$4 sm:$0xff]  }
  0x80   :  { %2882 = vmatpush2.bf16.msra.mxu1 %v4669_v19  ;;  %2922 = vmatprep.subr.bf16.mxu0 %v4680_v20  ;;  %v4759_v19 = vld [vmem:[%s6771_s1 + $0x8bc] ss:$12 sps:$4 sm:$0xff]   ;;  %v4754_v20 = vld [vmem:[%s6771_s1 + $0x738] ss:$12 sps:$4 sm:$0xff]  }
  0x81   :  { %2993 = vmatprep.subr.bf16.mxu1 %v4683_v21  ;;  %v4757_v21 = vld [vmem:[%s6771_s1 + $0x8b8] ss:$12 sps:$4 sm:$0xff]  }
  0x82   :  { %2813 = vmatmul.mubr.bf16.vlgmr.msra.gmra.mxu0 %v4672_v22  ;;  %v4762_v22 = vld [vmem:[%s6771_s1 + $0x724] ss:$12 sps:$4 sm:$0xff]  }
  0x83   :  { %2884 = vmatmul.mubr.bf16.vlgmr.msra.gmra.mxu1 %v4675_v23  ;;  %2923 = vmatpush1.bf16.msra.mxu0 %v4678_v24  ;;  %v4765_v23 = vld [vmem:[%s6771_s1 + $0x8a4] ss:$12 sps:$4 sm:$0xff]   ;;  %v4760_v24 = vld [vmem:[%s6771_s1 + $0x720] ss:$12 sps:$4 sm:$0xff]  }
  0x84   :  { %2994 = vmatpush1.bf16.msra.mxu1 %v4681_v25  ;;  %2924 = vmatprep.subr.bf16.mxu0 %v4686_v26  ;;  %v4763_v25 = vld [vmem:[%s6771_s1 + $0x8a0] ss:$12 sps:$4 sm:$0xff]  }
  0x85   :  { %2995 = vmatprep.subr.bf16.mxu1 %v4689_v27  ;;  %2822 = vmatprep.mubr.bf16.mxu0 %v4690_v28  ;;  %v4768_v26 = vld [vmem:[%s6771_s1 + $0x70c] ss:$12 sps:$4 sm:$0xff]   ;;  %v4766_v28 = vld [vmem:[%s6771_s1 + $0x708] ss:$12 sps:$4 sm:$0xff]  }
  0x86   :  { %2893 = vmatprep.mubr.bf16.mxu1 %v4699_v29  ;;  %v4771_v27 = vld [vmem:[%s6771_s1 + $0x88c] ss:$12 sps:$4 sm:$0xff]   ;;  %v4769_v29 = vld [vmem:[%s6771_s1 + $0x888] ss:$12 sps:$4 sm:$0xff]  }
  0x87   :  { %2925 = vmatpush1.bf16.msra.mxu0 %v4684_v30  ;;  %v4774_v30 = vld [vmem:[%s6771_s1 + $0x6f4] ss:$12 sps:$4 sm:$0xff]  }
  0x88   :  { %2996 = vmatpush1.bf16.msra.mxu1 %v4687_v31  ;;  %2926 = vmatprep.subr.bf16.mxu0 %v4695_v32  ;;  %v4777_v31 = vld [vmem:[%s6771_s1 + $0x874] ss:$12 sps:$4 sm:$0xff]   ;;  %v4772_v32 = vld [vmem:[%s6771_s1 + $0x6f0] ss:$12 sps:$4 sm:$0xff]  }
  0x89   :  { %2997 = vmatprep.subr.bf16.mxu1 %v4698_v33  ;;  %v4775_v33 = vld [vmem:[%s6771_s1 + $0x870] ss:$12 sps:$4 sm:$0xff]  }
  0x8a   :  { %2823 = vmatmul.mubr.bf16.gmra.mxu0 %v4692_v34  ;;  %v4780_v34 = vld [vmem:[%s6771_s1 + $0x6dc] ss:$12 sps:$4 sm:$0xff]  }
  0x8b   :  { %2894 = vmatmul.mubr.bf16.gmra.mxu1 %v4701_v37  ;;  %2927 = vmatpush1.bf16.msra.mxu0 %v4693_v35  ;;  %v4783_v35 = vld [vmem:[%s6771_s1 + $0x85c] ss:$12 sps:$4 sm:$0xff]   ;;  %v4781_v37 = vld [vmem:[%s6771_s1 + $0x858] ss:$12 sps:$4 sm:$0xff]  }
  0x8c   :  { %2998 = vmatpush1.bf16.msra.mxu1 %v4696_v36  ;;  %2928 = vmatprep.subr.bf16.mxu0 %v4704_v38  ;;  %v4778_v36 = vld [vmem:[%s6771_s1 + $0x6d8] ss:$12 sps:$4 sm:$0xff]  }
  0x8d   :  { %2999 = vmatprep.subr.bf16.mxu1 %v4707_v39  ;;  %2832 = vmatprep.mubr.bf16.mxu0 %v4708_v44  ;;  %v4786_v38 = vld [vmem:[%s6771_s1 + $0x6c4] ss:$12 sps:$4 sm:$0xff]   ;;  %v4784_v44 = vld [vmem:[%s6771_s1 + $0x6c0] ss:$12 sps:$4 sm:$0xff]  }
  0x8e   :  { %2903 = vmatprep.mubr.bf16.mxu1 %v4717_v45  ;;  %v4789_v39 = vld [vmem:[%s6771_s1 + $0x844] ss:$12 sps:$4 sm:$0xff]   ;;  %v4787_v45 = vld [vmem:[%s6771_s1 + $0x840] ss:$12 sps:$4 sm:$0xff]  }
  0x8f   :  { %2929 = vmatpush1.bf16.msra.mxu0 %v4702_v46  ;;  %v4798_v46 = vld [vmem:[%s6771_s1 + $0x9ac] ss:$12 sps:$4 sm:$0xff]  }
  0x90   :  { %3000 = vmatpush1.bf16.msra.mxu1 %v4705_v47  ;;  %2930 = vmatprep.subr.bf16.mxu0 %v4713_v48  ;;  %v4790_v47 = vld [vmem:[%s6772_s0 + $0x20] ss:$60 sps:$4 sm:$0xff]   ;;  %v4793_v48 = vld [vmem:[%s6772_s0 + $0x28] ss:$60 sps:$4 sm:$0xff]  }
  0x91   :  { %3001 = vmatprep.subr.bf16.mxu1 %v4716_v50  ;;  %v4796_v50 = vld [vmem:[%s6771_s1 + $0x9a8] ss:$12 sps:$4 sm:$0xff]  }
  0x92   :  { %2833 = vmatmul.mubr.bf16.gmra.mxu0 %v4710_v49  ;;  %v4801_v49 = vld [vmem:[%s6771_s1 + $0xa9c] ss:$12 sps:$4 sm:$0xff]  }
  0x93   :  { %2904 = vmatmul.mubr.bf16.gmra.mxu1 %v4719_v53  ;;  %2931 = vmatpush1.bf16.msra.mxu0 %v4711_v51  ;;  %v4799_v51 = vld [vmem:[%s6771_s1 + $0xa98] ss:$12 sps:$4 sm:$0xff]  }
  0x94   :  { %3002 = vmatpush1.bf16.msra.mxu1 %v4714_v52  ;;  %2932 = vmatprep.subr.bf16.mxu0 %v4722_v56  ;;  %v4804_v52 = vld [vmem:[%s6771_s1 + $0x994] ss:$12 sps:$4 sm:$0xff]   ;;  %v4805_v53 = vld [vmem:[%s6772_s0 + $0x9c] ss:$60 sps:$4 sm:$0xff]  }
  0x95   :  { %3003 = vmatprep.subr.bf16.mxu1 %v4725_v57  ;;  %2842 = vmatprep.mubr.bf16.mxu0 %v5598_v58  ;;  %v4802_v56 = vld [vmem:[%s6771_s1 + $0x990] ss:$12 sps:$4 sm:$0xff]  }
  0x96   :  { %2913 = vmatprep.mubr.bf16.mxu1 %v5600_v59  ;;  %v4813_v57 = vld [vmem:[%s6771_s1 + $0x97c] ss:$12 sps:$4 sm:$0xff]  }
  0x97   :  { %2933 = vmatpush1.bf16.msra.mxu0 %v4720_v60  ;;  %v4826_v60 = vld [vmem:[%s6771_s1 + $0xa80] ss:$12 sps:$4 sm:$0xff]  }
  0x98   :  { %3004 = vmatpush1.bf16.msra.mxu1 %v4723_v61  ;;  %2934 = vmatprep.subr.bf16.mxu0 %v4730_v62  ;;  %v4809_v61 = vld [vmem:[%s6772_s0 + $0x98] ss:$60 sps:$4 sm:$0xff]   ;;  %v4846_v62 = vld [vmem:[%s6771_s1 + $0x170] ss:$12 sps:$4 sm:$0xff]  }
  0x99   :  { %3005 = vmatprep.subr.bf16.mxu1 %v4733_v63  ;;  %v4810_v63 = vld [vmem:[%s6772_s0 + $0xa0] ss:$60 sps:$4 sm:$0xff]  }
  0x9a   :  { %2843 = vmatmul.mubr.bf16.gmra.mxu0 %v5616_v0 }
  0x9b   :  { %2914 = vmatmul.mubr.bf16.gmra.mxu1 %v5624_v3  ;;  %2935 = vmatpush1.bf16.msra.mxu0 %v4728_v1  ;;  %v4811_v1 = vld [vmem:[%s6771_s1 + $0x978] ss:$12 sps:$4 sm:$0xff]  }
  0x9c   :  { %3006 = vmatpush1.bf16.msra.mxu1 %v4731_v2  ;;  %2936 = vmatprep.subr.bf16.mxu0 %v4738_v4  ;;  %v4816_v2 = vld [vmem:[%s6771_s1 + $0x964] ss:$12 sps:$4 sm:$0xff]  }
  0x9d   :  { %3007 = vmatprep.subr.bf16.mxu1 %v4741_v5  ;;  %2954 = vmatprep.mubr.bf16.mxu0 %v4792_v6  ;;  %v4817_v4 = vld [vmem:[%s6772_s0 + $0x114] ss:$60 sps:$4 sm:$0xff]   ;;  %v4819_v5 = vld [vmem:[%s6772_s0 + $0x11c] ss:$60 sps:$4 sm:$0xff]   ;;  %v4814_v6 = vld [vmem:[%s6771_s1 + $0x960] ss:$12 sps:$4 sm:$0xff]  }
  0x9e   :  { %3025 = vmatprep.mubr.bf16.mxu1 %v4795_v7  ;;  %v4825_v7 = vld [vmem:[%s6771_s1 + $0x94c] ss:$12 sps:$4 sm:$0xff]  }
  0x9f   :  { %2937 = vmatpush1.bf16.msra.mxu0 %v4736_v8  ;;  %v4821_v8 = vld [vmem:[%s6772_s0 + $0x110] ss:$60 sps:$4 sm:$0xff]  }
  0xa0   :  { %3008 = vmatpush1.bf16.msra.mxu1 %v4739_v9  ;;  %2938 = vmatprep.subr.bf16.mxu0 %v4744_v10  ;;  %v64_v9 = vld [vmem:[%s6772_s0 + $0x188] sm:$0x11]  ;;  %v65_v10 = vld [vmem:[%s6772_s0 + $0x190] sm:$0x11] }
  0xa1   :  { %3009 = vmatprep.subr.bf16.mxu1 %v4747_v11  ;;  %v4822_v11 = vld [vmem:[%s6772_s0 + $0x118] ss:$60 sps:$4 sm:$0xff]  }
  0xa3   :  { %2939 = vmatpush2.bf16.msra.mxu0 %v4742_v12  ;;  %v4823_v12 = vld [vmem:[%s6771_s1 + $0x948] ss:$12 sps:$4 sm:$0xff]  }
  0xa4   :  { %3010 = vmatpush2.bf16.msra.mxu1 %v4745_v13  ;;  %2940 = vmatprep.subr.bf16.mxu0 %v4750_v14  ;;  %v5823_v13 = vcombine.high %v64_v9, %v64_v9  ;;  %v4831_v14 = vld [vmem:[%s6771_s1 + $0x934] ss:$12 sps:$4 sm:$0xff]  }
  0xa5   :  { %3011 = vmatprep.subr.bf16.mxu1 %v4753_v15  ;;  %v5828_v15 = vcombine.high %v65_v10, %v65_v10 }
  0xa7   :  { %2941 = vmatpush2.bf16.msra.mxu0 %v4748_v16  ;;  %v4829_v16 = vld [vmem:[%s6771_s1 + $0x930] ss:$12 sps:$4 sm:$0xff]  }
  0xa8   :  { %3012 = vmatpush2.bf16.msra.mxu1 %v4751_v17  ;;  %2942 = vmatprep.subr.bf16.mxu0 %v4756_v18  ;;  %v4838_v17 = vld [vmem:[%s6771_s1 + $0x91c] ss:$12 sps:$4 sm:$0xff]   ;;  %v5838_v18 = vcombine.low %v64_v9, %v64_v9 }
  0xa9   :  { %3013 = vmatprep.subr.bf16.mxu1 %v4759_v19  ;;  %v5840_v19 = vcombine.low %v65_v10, %v65_v10  ;;  %v4892_v9 = vld [vmem:[%s6771_s1 + $0x3b0] ss:$12 sps:$4 sm:$0xff]   ;;  %v4893_v10 = vld [vmem:[%s6771_s1 + $0x2d8] ss:$12 sps:$4 sm:$0xff]  }
  0xab   :  { %2943 = vmatpush2.bf16.msra.mxu0 %v4754_v20  ;;  %v4836_v20 = vld [vmem:[%s6771_s1 + $0x918] ss:$12 sps:$4 sm:$0xff]  }
  0xac   :  { %3014 = vmatpush2.bf16.msra.mxu1 %v4757_v21  ;;  %2944 = vmatprep.subr.bf16.mxu0 %v4762_v22  ;;  %v4841_v21 = vld [vmem:[%s6771_s1 + $0x904] ss:$12 sps:$4 sm:$0xff]  }
  0xad   :  { %3015 = vmatprep.subr.bf16.mxu1 %v4765_v23  ;;  %v4888_v22 = vld [vmem:[%s6772_s0 + $0x34] ss:$60 sps:$4 sm:$0xff]   ;;  %v4839_v23 = vld [vmem:[%s6771_s1 + $0x900] ss:$12 sps:$4 sm:$0xff]  }
  0xaf   :  { %2945 = vmatpush2.bf16.msra.mxu0 %v4760_v24  ;;  %v5036_v24 = vmov 0  }
  0xb0   :  { %3016 = vmatpush2.bf16.msra.mxu1 %v4763_v25  ;;  %2946 = vmatprep.subr.bf16.mxu0 %v4768_v26  ;;  %v4844_v25 = vld [vmem:[%s6771_s1 + $0xa6c] ss:$12 sps:$4 sm:$0xff]   ;;  %v4842_v26 = vld [vmem:[%s6771_s1 + $0xa68] ss:$12 sps:$4 sm:$0xff]  }
  0xb1   :  { %3017 = vmatprep.subr.bf16.mxu1 %v4771_v27  ;;  %v4845_v27 = vld [vmem:[%s6772_s0 + $0x38] ss:$60 sps:$4 sm:$0xff]  }
  0xb3   :  { %2947 = vmatpush2.bf16.msra.mxu0 %v4766_v28  ;;  %v4847_v28 = vld [vmem:[%s6771_s1 + $0xb0] ss:$12 sps:$4 sm:$0xff]  }
  0xb4   :  { %3018 = vmatpush2.bf16.msra.mxu1 %v4769_v29  ;;  %2948 = vmatprep.subr.bf16.mxu0 %v4774_v30  ;;  %v4850_v29 = vld [vmem:[%s6771_s1 + $0xa54] ss:$12 sps:$4 sm:$0xff]   ;;  %v4851_v30 = vld [vmem:[%s6771_s1 + $0x158] ss:$12 sps:$4 sm:$0xff]  }
  0xb5   :  { %3019 = vmatprep.subr.bf16.mxu1 %v4777_v31  ;;  %v4848_v31 = vld [vmem:[%s6771_s1 + $0xa50] ss:$12 sps:$4 sm:$0xff]  }
  0xb7   :  { %2949 = vmatpush2.bf16.msra.mxu0 %v4772_v32  ;;  %v4852_v32 = vld [vmem:[%s6771_s1 + $0x98] ss:$12 sps:$4 sm:$0xff]  }
  0xb8   :  { %3020 = vmatpush2.bf16.msra.mxu1 %v4775_v33  ;;  %2950 = vmatprep.subr.bf16.mxu0 %v4780_v34  ;;  %v4855_v33 = vld [vmem:[%s6771_s1 + $0xa3c] ss:$12 sps:$4 sm:$0xff]   ;;  %v4857_v34 = vld [vmem:[%s6771_s1 + $0x140] ss:$12 sps:$4 sm:$0xff]  }
  0xb9   :  { %3021 = vmatprep.subr.bf16.mxu1 %v4783_v35  ;;  %v4853_v35 = vld [vmem:[%s6771_s1 + $0xa38] ss:$12 sps:$4 sm:$0xff]  }
  0xbb   :  { %2951 = vmatpush2.bf16.msra.mxu0 %v4778_v36  ;;  %v4856_v36 = vld [vmem:[%s6772_s0 + $0xb0] ss:$60 sps:$4 sm:$0xff]  }
  0xbc   :  { %3022 = vmatpush2.bf16.msra.mxu1 %v4781_v37  ;;  %2952 = vmatprep.subr.bf16.mxu0 %v4786_v38  ;;  %v4858_v37 = vld [vmem:[%s6771_s1 + $0x80] ss:$12 sps:$4 sm:$0xff]   ;;  %v4861_v38 = vld [vmem:[%s6771_s1 + $0xa24] ss:$12 sps:$4 sm:$0xff]  }
  0xbd   :  { %3023 = vmatprep.subr.bf16.mxu1 %v4789_v39  ;;  %v4862_v39 = vld [vmem:[%s6771_s1 + $0x128] ss:$12 sps:$4 sm:$0xff]  }
  0xbf   :  { %2953 = vmatpush2.bf16.msra.mxu0 %v4784_v44  ;;  %v4859_v44 = vld [vmem:[%s6771_s1 + $0xa20] ss:$12 sps:$4 sm:$0xff]  }
  0xc0   :  { %3024 = vmatpush2.bf16.msra.mxu1 %v4787_v45  ;;  %3064 = vmatprep.subr.bf16.mxu0 %v4798_v46  ;;  %v4863_v45 = vld [vmem:[%s6771_s1 + $0x68] ss:$12 sps:$4 sm:$0xff]   ;;  %v4866_v46 = vld [vmem:[%s6771_s1 + $0xa0c] ss:$12 sps:$4 sm:$0xff]  }
  0xc1   :  { %3147 = vmatprep.subr.bf16.mxu1 %v4801_v49  ;;  %v4867_v49 = vld [vmem:[%s6772_s0 + $0x128] ss:$60 sps:$4 sm:$0xff]  }
  0xc2   :  { %2955 = vmatmul.mubr.bf16.vlgmr.msra.gmra.mxu0 %v4790_v47  ;;  %v4868_v47 = vld [vmem:[%s6771_s1 + $0x110] ss:$12 sps:$4 sm:$0xff]  }
  0xc3   :  { %3026 = vmatmul.mubr.bf16.vlgmr.msra.gmra.mxu1 %v4793_v48  ;;  %3065 = vmatpush1.bf16.msra.mxu0 %v4796_v50  ;;  %v4864_v48 = vld [vmem:[%s6771_s1 + $0xa08] ss:$12 sps:$4 sm:$0xff]   ;;  %v4869_v50 = vld [vmem:[%s6771_s1 + $0x50] ss:$12 sps:$4 sm:$0xff]  }
  0xc4   :  { %3148 = vmatpush1.bf16.msra.mxu1 %v4799_v51  ;;  %3066 = vmatprep.subr.bf16.mxu0 %v4804_v52  ;;  %v4872_v51 = vld [vmem:[%s6771_s1 + $0x9f4] ss:$12 sps:$4 sm:$0xff]   ;;  %v4873_v52 = vld [vmem:[%s6771_s1 + $0xf8] ss:$12 sps:$4 sm:$0xff]  }
  0xc5   :  { %2964 = vmatprep.mubr.bf16.mxu0 %v4805_v53  ;;  %3035 = vmatprep.mubr.bf16.mxu1 %v4807_v54  ;;  %v4870_v53 = vld [vmem:[%s6771_s1 + $0x9f0] ss:$12 sps:$4 sm:$0xff]   ;;  %v4874_v54 = vld [vmem:[%s6771_s1 + $0x38] ss:$12 sps:$4 sm:$0xff]  }
  0xc6   :  { %3149 = vmatprep.subr.bf16.mxu1 %v4828_v55  ;;  %v4877_v55 = vld [vmem:[%s6771_s1 + $0x9dc] ss:$12 sps:$4 sm:$0xff]  }
  0xc7   :  { %3067 = vmatpush1.bf16.msra.mxu0 %v4802_v56  ;;  %v4878_v56 = vld [vmem:[%s6772_s0 + $0x1a0] ss:$0 sps:$4 sm:$0x11]  }
  0xc8   :  { %3150 = vmatpush1.bf16.msra.mxu1 %v4826_v60  ;;  %3068 = vmatprep.subr.bf16.mxu0 %v4813_v57  ;;  %v4879_v57 = vld [vmem:[%s6771_s1 + $0xe0] ss:$12 sps:$4 sm:$0xff]   ;;  %v4875_v60 = vld [vmem:[%s6771_s1 + $0x9d8] ss:$12 sps:$4 sm:$0xff]  }
  0xc9   :  { %4155 = vmatprep.subr.bf16.mxu1 %v4846_v62  ;;  %v4883_v62 = vld [vmem:[%s6771_s1 + $0x9c4] ss:$12 sps:$4 sm:$0xff]  }
  0xca   :  { %2965 = vmatmul.mubr.bf16.gmra.mxu0 %v4809_v61  ;;  %v4880_v61 = vld [vmem:[%s6771_s1 + $0x20] ss:$12 sps:$4 sm:$0xff]  }
  0xcb   :  { %3036 = vmatmul.mubr.bf16.gmra.mxu1 %v4810_v63  ;;  %3069 = vmatpush1.bf16.msra.mxu0 %v4811_v1  ;;  %v4884_v63 = vld [vmem:[%s6771_s1 + $0xc8] ss:$12 sps:$4 sm:$0xff]   ;;  %v4881_v1 = vld [vmem:[%s6771_s1 + $0x9c0] ss:$12 sps:$4 sm:$0xff]  }
  0xcc   :  { %2974 = vmatprep.mubr.bf16.mxu0 %v4817_v4  ;;  %3070 = vmatprep.subr.bf16.mxu0 %v4816_v2  ;;  %v4885_v2 = vld [vmem:[%s6771_s1 + $0x8] ss:$12 sps:$4 sm:$0xff]   ;;  %v4889_v4 = vld [vmem:[%s6771_s1 + $0x2f0] ss:$12 sps:$4 sm:$0xff]  }
  0xcd   :  { %3045 = vmatprep.mubr.bf16.mxu1 %v4819_v5  ;;  %v5971_v5 = vld [vmem:[%s6772_s0 + $0x30] ss:$60 sps:$4 sm:$0xff]  }
  0xcf   :  { %3071 = vmatpush1.bf16.msra.mxu0 %v4814_v6  ;;  %v4890_v6 = vld [vmem:[%s6771_s1 + $0x470] ss:$12 sps:$4 sm:$0xff]  }
  0xd0   :  { %3072 = vmatprep.subr.bf16.mxu0 %v4825_v7  ;;  %v4995_v7 = vld [vmem:[%s6772_s0 + $0x4] ss:$60 sps:$4 sm:$0xff]  }
  0xd2   :  { %2975 = vmatmul.mubr.bf16.gmra.mxu0 %v4821_v8  ;;  %v4891_v8 = vld [vmem:[%s6771_s1 + $0x230] ss:$12 sps:$4 sm:$0xff]  }
  0xd3   :  { %3046 = vmatmul.mubr.bf16.gmra.mxu1 %v4822_v11  ;;  %3073 = vmatpush1.bf16.msra.mxu0 %v4823_v12  ;;  %v4894_v11 = vld [vmem:[%s6771_s1 + $0x458] ss:$12 sps:$4 sm:$0xff]  }
  0xd4   :  { %2984 = vmatprep.mubr.bf16.mxu0 %v5823_v13  ;;  %3074 = vmatprep.subr.bf16.mxu0 %v4831_v14  ;;  %v4895_v12 = vld [vmem:[%s6771_s1 + $0x218] ss:$12 sps:$4 sm:$0xff]   ;;  %v5997_v14 = vld [vmem:[%s6772_s0 + $0xac] ss:$60 sps:$4 sm:$0xff]  }
  0xd5   :  { %3055 = vmatprep.mubr.bf16.mxu1 %v5828_v15 }
  0xd7   :  { %3075 = vmatpush1.bf16.msra.mxu0 %v4829_v16 }
  0xd8   :  { %3076 = vmatprep.subr.bf16.mxu0 %v4838_v17 }
  0xda   :  { %2985 = vmatmul.mubr.bf16.gmra.mxu0 %v5838_v18 }
  0xdb   :  { %3056 = vmatmul.mubr.bf16.gmra.mxu1 %v5840_v19  ;;  %3077 = vmatpush1.bf16.msra.mxu0 %v4836_v20  ;;  %v4996_v20 = vld [vmem:[%s6772_s0] ss:$60 sps:$4 sm:$0xff]  }
  0xdc   :  { %3167 = vmatprep.mubr.bf16.mxu1 %v5036_v24  ;;  %3078 = vmatprep.subr.bf16.mxu0 %v4841_v21  ;;  %v4896_v21 = vld [vmem:[%s6771_s1 + $0x398] ss:$12 sps:$4 sm:$0xff]  }
  0xdd   :  { %3096 = vmatprep.mubr.bf16.mxu0 %v4888_v22 }
  0xdf   :  { %3079 = vmatpush1.bf16.msra.mxu0 %v4839_v23  ;;  %v4900_v23 = vld [vmem:[%s6771_s1 + $0x2c0] ss:$12 sps:$4 sm:$0xff]  }
  0xe0   :  { %3080 = vmatprep.subr.bf16.mxu0 %v4844_v25 }
  0xe3   :  { %4147 = vmatmul.mubr.msk.bf16.vlgmr.msra.gmra.mxu1 %vm2625_vm0, %v4845_v27  ;;  %3081 = vmatpush2.bf16.msra.mxu0 %v4842_v26  ;;  %v6014_v26 = vld [vmem:[%s6772_s0 + $0xa8] ss:$60 sps:$4 sm:$0xff]   ;;  %v4901_v27 = vld [vmem:[%s6771_s1 + $0x440] ss:$12 sps:$4 sm:$0xff]  }
  0xe4   :  { %4156 = vmatpush3.bf16.msra.mxu1 %v4847_v28  ;;  %3082 = vmatprep.subr.bf16.mxu0 %v4850_v29  ;;  %v4997_v29 = vld [vmem:[%s6772_s0 + $0x7c] ss:$60 sps:$4 sm:$0xff]  }
  0xe5   :  { %4157 = vmatprep.subr.bf16.mxu1 %v4851_v30  ;;  %3177 = vmatprep.mubr.bf16.mxu1 %v5036_v24  ;;  %v4902_v30 = vld [vmem:[%s6771_s1 + $0x200] ss:$12 sps:$4 sm:$0xff]  }
  0xe7   :  { %3083 = vmatpush2.bf16.msra.mxu0 %v4848_v31 }
  0xe8   :  { %4158 = vmatpush3.bf16.msra.mxu1 %v4852_v32  ;;  %3084 = vmatprep.subr.bf16.mxu0 %v4855_v33  ;;  %v4903_v33 = vld [vmem:[%s6771_s1 + $0x380] ss:$12 sps:$4 sm:$0xff]  }
  0xe9   :  { %4159 = vmatprep.subr.bf16.mxu1 %v4857_v34 }
  0xeb   :  { %4148 = vmatmul.mubr.msk.bf16.gmra.mxu1 %vm2625_vm0, %v4856_v36  ;;  %3085 = vmatpush2.bf16.msra.mxu0 %v4853_v35  ;;  %v4904_v35 = vld [vmem:[%s6771_s1 + $0x2a8] ss:$12 sps:$4 sm:$0xff]  }
  0xec   :  { %4160 = vmatpush3.bf16.msra.mxu1 %v4858_v37  ;;  %3086 = vmatprep.subr.bf16.mxu0 %v4861_v38  ;;  %v4905_v38 = vld [vmem:[%s6771_s1 + $0x428] ss:$12 sps:$4 sm:$0xff]  }
  0xed   :  { %4161 = vmatprep.subr.bf16.mxu1 %v4862_v39  ;;  %3187 = vmatprep.mubr.bf16.mxu1 %v5036_v24  ;;  %v4906_v39 = vld [vmem:[%s6771_s1 + $0x1e8] ss:$12 sps:$4 sm:$0xff]  }
  0xef   :  { %3087 = vmatpush2.bf16.msra.mxu0 %v4859_v44  ;;  %v6049_v44 = vld [vmem:[%s6772_s0 + $0x124] ss:$60 sps:$4 sm:$0xff]  }
  0xf0   :  { %4162 = vmatpush3.bf16.msra.mxu1 %v4863_v45  ;;  %3088 = vmatprep.subr.bf16.mxu0 %v4866_v46  ;;  %v4998_v45 = vld [vmem:[%s6772_s0 + $0x78] ss:$60 sps:$4 sm:$0xff]  }
  0xf1   :  { %4163 = vmatprep.subr.bf16.mxu1 %v4868_v47  ;;  %v4907_v46 = vld [vmem:[%s6771_s1 + $0x368] ss:$12 sps:$4 sm:$0xff]  }
  0xf3   :  { %4149 = vmatmul.mubr.msk.bf16.gmra.mxu1 %vm2625_vm0, %v4867_v49  ;;  %3089 = vmatpush2.bf16.msra.mxu0 %v4864_v48  ;;  %v4911_v49 = vld [vmem:[%s6771_s1 + $0x290] ss:$12 sps:$4 sm:$0xff]  }
  0xf4   :  { %4164 = vmatpush3.bf16.msra.mxu1 %v4869_v50  ;;  %3090 = vmatprep.subr.bf16.mxu0 %v4872_v51  ;;  %v6066_v51 = vld [vmem:[%s6772_s0 + $0x120] ss:$60 sps:$4 sm:$0xff]  }
  0xf5   :  { %4165 = vmatprep.subr.bf16.mxu1 %v4873_v52  ;;  %3197 = vmatprep.mubr.bf16.mxu1 %v5036_v24  ;;  %v4912_v52 = vld [vmem:[%s6771_s1 + $0x410] ss:$12 sps:$4 sm:$0xff]  }
  0xf7   :  { %3091 = vmatpush2.bf16.msra.mxu0 %v4870_v53 }
  0xf8   :  { %4166 = vmatpush3.bf16.msra.mxu1 %v4874_v54  ;;  %3092 = vmatprep.subr.bf16.mxu0 %v4877_v55  ;;  %v4999_v55 = vld [vmem:[%s6772_s0 + $0xf4] ss:$60 sps:$4 sm:$0xff]  }
  0xf9   :  { %4167 = vmatprep.subr.bf16.mxu1 %v4879_v57  ;;  %v4914_v57 = vld [vmem:[%s6771_s1 + $0x350] ss:$12 sps:$4 sm:$0xff]  }
  0xfb   :  { %4150 = vmatmul.mubr.msk.bf16.gmra.mxu1 %vm2625_vm0, %v4878_v56  ;;  %3093 = vmatpush2.bf16.msra.mxu0 %v4875_v60  ;;  %v4913_v56 = vld [vmem:[%s6771_s1 + $0x1d0] ss:$12 sps:$4 sm:$0xff]  }
  0xfc   :  { %4168 = vmatpush3.bf16.msra.mxu1 %v4880_v61  ;;  %3094 = vmatprep.subr.bf16.mxu0 %v4883_v62  ;;  %v66_v61 = vld [vmem:[%s6772_s0 + $0x198] sm:$0x11] }
  0xfd   :  { %4169 = vmatprep.subr.bf16.mxu1 %v4884_v63  ;;  %3238 = vmatprep.mubr.bf16.mxu1 %v4995_v7 }
  0xff   :  { %3095 = vmatpush2.bf16.msra.mxu0 %v4881_v1  ;;  %v4915_v1 = vld [vmem:[%s6771_s1 + $0x278] ss:$12 sps:$4 sm:$0xff]  }
 0x100   :  { %4170 = vmatpush3.bf16.msra.mxu1 %v4885_v2  ;;  %4195 = vmatprep.subr.bf16.mxu0 %v4889_v4  ;;  %v4916_v4 = vld [vmem:[%s6771_s1 + $0x3f8] ss:$12 sps:$4 sm:$0xff]  }
 0x101   :  { %4235 = vmatprep.subr.bf16.mxu1 %v4890_v6 }
 0x102   :  { %v2672_v16 = vpop.f32.mrf.mxu0  ;;  %3097 = vmatmul.mubr.bf16.vlgmr.msra.gmra.mxu0 %v5971_v5 }
 0x103   :  { %v2743_v17 = vpop.f32.mrf.mxu1  ;;  %3239 = vmatmul.mubr.bf16.vlgmr.msra.gmra.mxu1 %v4996_v20  ;;  %4196 = vmatpush3.bf16.msra.mxu0 %v4891_v8  ;;  %v4917_v8 = vld [vmem:[%s6771_s1 + $0x1b8] ss:$12 sps:$4 sm:$0xff]  }
 0x104   :  { %v6006_v22 = vadd.f32 %v2743_v17, %v2672_v16  ;;  %4236 = vmatpush3.bf16.msra.mxu1 %v4892_v9  ;;  %v2674_v24 = vpop.f32.mrf.mxu0  ;;  %4197 = vmatprep.subr.bf16.mxu0 %v4893_v10  ;;  %v6101_v9 = vcombine.high %v66_v61, %v66_v61  ;;  %v5000_v10 = vld [vmem:[%s6772_s0 + $0xf0] ss:$60 sps:$4 sm:$0xff]  }
 0x105   :  { %v2745_v25 = vpop.f32.mrf.mxu1  ;;  %4237 = vmatprep.subr.bf16.mxu1 %v4894_v11  ;;  %3106 = vmatprep.mubr.bf16.mxu0 %v5997_v14  ;;  %v4918_v11 = vld [vmem:[%s6771_s1 + $0x338] ss:$12 sps:$4 sm:$0xff]   ;;  %v4921_v17 = vld [vmem:[%s6771_s1 + $0x260] ss:$12 sps:$4 sm:$0xff]  }
 0x106   :  { %v6019_v28 = vadd.f32 %v2745_v25, %v2674_v24  ;;  %3246 = vmatprep.mubr.bf16.mxu1 %v4997_v29  ;;  %v2676_v31 = vpop.f32.mrf.mxu0  ;;  %v4923_v25 = vld [vmem:[%s6771_s1 + $0x1a0] ss:$12 sps:$4 sm:$0xff]   ;;  %v6125_v29 = vcombine.low %v66_v61, %v66_v61 }
 0x107   :  { %v2747_v32 = vpop.f32.mrf.mxu1  ;;  %4198 = vmatpush3.bf16.msra.mxu0 %v4895_v12 }
 0x108   :  { %v6031_v34 = vadd.f32 %v2747_v32, %v2676_v31  ;;  %4238 = vmatpush3.bf16.msra.mxu1 %v4896_v21  ;;  %v6036_v36 = vpop.f32.mrf.mxu0  ;;  %4199 = vmatprep.subr.bf16.mxu0 %v4900_v23  ;;  %v4922_v21 = vld [vmem:[%s6771_s1 + $0x3e0] ss:$12 sps:$4 sm:$0xff]  }
 0x109   :  { %v6038_v37 = vpop.f32.mrf.mxu1  ;;  %4239 = vmatprep.subr.bf16.mxu1 %v4901_v27 }
 0x10a   :  { %3107 = vmatmul.mubr.bf16.gmra.mxu0 %v6014_v26  ;;  %v2682_v47 = vpop.f32.mrf.mxu0 }
 0x10b   :  { %3247 = vmatmul.mubr.bf16.gmra.mxu1 %v4998_v45  ;;  %v2753_v48 = vpop.f32.mrf.mxu1  ;;  %4200 = vmatpush3.bf16.msra.mxu0 %v4902_v30  ;;  %v4924_v30 = vld [vmem:[%s6771_s1 + $0x320] ss:$12 sps:$4 sm:$0xff]   ;;  %v4927_v45 = vld [vmem:[%s6771_s1 + $0x188] ss:$12 sps:$4 sm:$0xff]  }
 0x10c   :  { %4240 = vmatpush3.bf16.msra.mxu1 %v4903_v33  ;;  %v6061_v50 = vadd.f32 %v2753_v48, %v2682_v47  ;;  %4201 = vmatprep.subr.bf16.mxu0 %v4904_v35  ;;  %v2684_v53 = vpop.f32.mrf.mxu0  ;;  %v4926_v35 = vld [vmem:[%s6771_s1 + $0x3c8] ss:$12 sps:$4 sm:$0xff]  }
 0x10d   :  { %4241 = vmatprep.subr.bf16.mxu1 %v4905_v38  ;;  %v2755_v54 = vpop.f32.mrf.mxu1  ;;  %3116 = vmatprep.mubr.bf16.mxu0 %v6049_v44 }
 0x10e   :  { %3254 = vmatprep.mubr.bf16.mxu1 %v4999_v55  ;;  %v6081_v60 = vadd.f32 %v2755_v54, %v2684_v53  ;;  %v2686_v62 = vpop.f32.mrf.mxu0  ;;  %v5001_v55 = vld [vmem:[%s6772_s0 + $0xc] ss:$60 sps:$4 sm:$0xff]  }
 0x10f   :  { %v2757_v63 = vpop.f32.mrf.mxu1  ;;  %4202 = vmatpush3.bf16.msra.mxu0 %v4906_v39 }
 0x110   :  { %4242 = vmatpush3.bf16.msra.mxu1 %v4907_v46  ;;  %v6089_v2 = vadd.f32 %v2757_v63, %v2686_v62  ;;  %4203 = vmatprep.subr.bf16.mxu0 %v4911_v49  ;;  %v6094_v6 = vpop.f32.mrf.mxu0  ;;  %v4928_v46 = vld [vmem:[%s6771_s1 + $0x308] ss:$12 sps:$4 sm:$0xff]   ;;  %v4929_v49 = vld [vmem:[%s6771_s1 + $0x5f0] ss:$12 sps:$4 sm:$0xff]  }
 0x111   :  { %4243 = vmatprep.subr.bf16.mxu1 %v4912_v52  ;;  %v6096_v7 = vpop.f32.mrf.mxu1  ;;  %v4932_v62 = vld [vmem:[%s6771_s1 + $0x6b0] ss:$12 sps:$4 sm:$0xff]  }
 0x112   :  { %3117 = vmatmul.mubr.bf16.gmra.mxu0 %v6066_v51  ;;  %v2692_v12 = vpop.f32.mrf.mxu0 }
 0x113   :  { %3255 = vmatmul.mubr.bf16.gmra.mxu1 %v5000_v10  ;;  %v2763_v16 = vpop.f32.mrf.mxu1  ;;  %4204 = vmatpush3.bf16.msra.mxu0 %v4913_v56  ;;  %v5002_v56 = vld [vmem:[%s6772_s0 + $0x14] ss:$60 sps:$4 sm:$0xff]  }
 0x114   :  { %4244 = vmatpush3.bf16.msra.mxu1 %v4914_v57  ;;  %v6113_v20 = vadd.f32 %v2763_v16, %v2692_v12  ;;  %4205 = vmatprep.subr.bf16.mxu0 %v4915_v1  ;;  %v2694_v23 = vpop.f32.mrf.mxu0  ;;  %v4931_v57 = vld [vmem:[%s6771_s1 + $0x530] ss:$12 sps:$4 sm:$0xff]   ;;  %v4935_v12 = vld [vmem:[%s6771_s1 + $0x518] ss:$12 sps:$4 sm:$0xff]  }
 0x115   :  { %4245 = vmatprep.subr.bf16.mxu1 %v4916_v4  ;;  %v2765_v24 = vpop.f32.mrf.mxu1  ;;  %3126 = vmatprep.mubr.bf16.mxu0 %v6101_v9  ;;  %v4933_v4 = vld [vmem:[%s6771_s1 + $0x5d8] ss:$12 sps:$4 sm:$0xff]  }
 0x116   :  { %3262 = vmatprep.mubr.bf16.mxu1 %v5364_v40  ;;  %v6123_v27 = vadd.f32 %v2765_v24, %v2694_v23  ;;  %v2696_v31 = vpop.f32.mrf.mxu0  ;;  %v4925_v40 = vld [vmem:[%s6771_s1 + $0x248] ss:$12 sps:$4 sm:$0xff]   ;;  %v4937_v23 = vld [vmem:[%s6771_s1 + $0x5c0] ss:$12 sps:$4 sm:$0xff]  }
 0x117   :  { %v2767_v32 = vpop.f32.mrf.mxu1  ;;  %4206 = vmatpush3.bf16.msra.mxu0 %v4917_v8  ;;  %v4934_v8 = vld [vmem:[%s6771_s1 + $0x758] ss:$12 sps:$4 sm:$0xff]   ;;  %v4938_v24 = vld [vmem:[%s6771_s1 + $0x740] ss:$12 sps:$4 sm:$0xff]  }
 0x118   :  { %4246 = vmatpush3.bf16.msra.mxu1 %v4918_v11  ;;  %v6133_v33 = vadd.f32 %v2767_v32, %v2696_v31  ;;  %4207 = vmatprep.subr.bf16.mxu0 %v4921_v17  ;;  %v6138_v38 = vpop.f32.mrf.mxu0  ;;  %v5003_v16 = vld [vmem:[%s6772_s0 + $0x8] ss:$60 sps:$4 sm:$0xff]   ;;  %v5004_v17 = vld [vmem:[%s6772_s0 + $0x10] ss:$60 sps:$4 sm:$0xff]  }
 0x119   :  { %4247 = vmatprep.subr.bf16.mxu1 %v4922_v21  ;;  %v6140_v39 = vpop.f32.mrf.mxu1  ;;  %v4936_v21 = vld [vmem:[%s6771_s1 + $0x698] ss:$12 sps:$4 sm:$0xff]   ;;  %v4939_v31 = vld [vmem:[%s6771_s1 + $0x500] ss:$12 sps:$4 sm:$0xff]  }
 0x11a   :  { %3127 = vmatmul.mubr.bf16.gmra.mxu0 %v6125_v29  ;;  %v2702_v47 = vpop.f32.mrf.mxu0  ;;  %v4940_v32 = vld [vmem:[%s6771_s1 + $0x680] ss:$12 sps:$4 sm:$0xff]  }
 0x11b   :  { %3263 = vmatmul.mubr.bf16.gmra.mxu1 %v5368_v42  ;;  %v2773_v48 = vpop.f32.mrf.mxu1  ;;  %4208 = vmatpush3.bf16.msra.mxu0 %v4923_v25  ;;  %v4930_v42 = vld [vmem:[%s6771_s1 + $0x770] ss:$12 sps:$4 sm:$0xff]   ;;  %v5005_v25 = vld [vmem:[%s6772_s0 + $0x84] ss:$60 sps:$4 sm:$0xff]  }
 0x11c   :  { %4248 = vmatpush3.bf16.msra.mxu1 %v4924_v30  ;;  %v6153_v52 = vadd.f32 %v2773_v48, %v2702_v47  ;;  %4209 = vmatprep.subr.bf16.mxu0 %v4925_v40  ;;  %v2704_v53 = vpop.f32.mrf.mxu0  ;;  %v5006_v30 = vld [vmem:[%s6772_s0 + $0x8c] ss:$60 sps:$4 sm:$0xff]  }
 0x11d   :  { %4249 = vmatprep.subr.bf16.mxu1 %v4926_v35  ;;  %v2775_v54 = vpop.f32.mrf.mxu1  ;;  %3302 = vmatprep.mubr.bf16.mxu0 %v5001_v55  ;;  %v4941_v40 = vld [vmem:[%s6771_s1 + $0x5a8] ss:$12 sps:$4 sm:$0xff]   ;;  %v4947_v55 = vld [vmem:[%s6771_s1 + $0x4d0] ss:$12 sps:$4 sm:$0xff]  }
 0x11e   :  { %3366 = vmatprep.mubr.bf16.mxu1 %v5002_v56  ;;  %v6167_v61 = vadd.f32 %v2775_v54, %v2704_v53  ;;  %v2706_v63 = vpop.f32.mrf.mxu0  ;;  %v4942_v35 = vld [vmem:[%s6771_s1 + $0x728] ss:$12 sps:$4 sm:$0xff]   ;;  %v5009_v53 = vld [vmem:[%s6772_s0 + $0xfc] ss:$60 sps:$4 sm:$0xff]   ;;  %v5010_v54 = vld [vmem:[%s6772_s0 + $0x104] ss:$60 sps:$4 sm:$0xff]  }
 0x11f   :  { %v2777_v1 = vpop.f32.mrf.mxu1  ;;  %4210 = vmatpush3.bf16.msra.mxu0 %v4927_v45  ;;  %v5007_v45 = vld [vmem:[%s6772_s0 + $0x80] ss:$60 sps:$4 sm:$0xff]   ;;  %v4943_v47 = vld [vmem:[%s6771_s1 + $0x4e8] ss:$12 sps:$4 sm:$0xff]  }
 0x120   :  { %4250 = vmatpush3.bf16.msra.mxu1 %v4928_v46  ;;  %4275 = vmatprep.subr.bf16.mxu0 %v4929_v49  ;;  %v2707_v10 = vpop.f32.mrf.mxu0  ;;  %v5008_v46 = vld [vmem:[%s6772_s0 + $0x88] ss:$60 sps:$4 sm:$0xff]   ;;  %v4945_v49 = vld [vmem:[%s6771_s1 + $0x590] ss:$12 sps:$4 sm:$0xff]   ;;  %v5011_v63 = vld [vmem:[%s6772_s0 + $0xf8] ss:$60 sps:$4 sm:$0xff]  }
 0x121   :  { %4315 = vmatprep.subr.bf16.mxu1 %v4930_v42  ;;  %v2778_v11 = vpop.f32.mrf.mxu1  ;;  %v4944_v48 = vld [vmem:[%s6771_s1 + $0x668] ss:$12 sps:$4 sm:$0xff]   ;;  %v4946_v42 = vld [vmem:[%s6771_s1 + $0x710] ss:$12 sps:$4 sm:$0xff]   ;;  %v4953_v10 = vld [vmem:[%s6771_s1 + $0x560] ss:$12 sps:$4 sm:$0xff]  }
 0x122   :  { %3303 = vmatmul.mubr.bf16.vlgmr.msra.gmra.mxu0 %v5003_v16  ;;  %v4948_v56 = vld [vmem:[%s6771_s1 + $0x650] ss:$12 sps:$4 sm:$0xff]   ;;  %v4954_v11 = vld [vmem:[%s6771_s1 + $0x6e0] ss:$12 sps:$4 sm:$0xff]  }
 0x123   :  { %3367 = vmatmul.mubr.bf16.vlgmr.msra.gmra.mxu1 %v5004_v17  ;;  %4276 = vmatpush3.bf16.msra.mxu0 %v4931_v57  ;;  %v4949_v57 = vld [vmem:[%s6771_s1 + $0x578] ss:$12 sps:$4 sm:$0xff]   ;;  %v5012_v1 = vld [vmem:[%s6772_s0 + $0x100] ss:$60 sps:$4 sm:$0xff]   ;;  %v4957_v17 = vld [vmem:[%s6771_s1 + $0x548] ss:$12 sps:$4 sm:$0xff]  }
 0x124   :  { %4316 = vmatpush3.bf16.msra.mxu1 %v4932_v62  ;;  %4277 = vmatprep.subr.bf16.mxu0 %v4933_v4  ;;  %v4950_v62 = vld [vmem:[%s6771_s1 + $0x6f8] ss:$12 sps:$4 sm:$0xff]   ;;  %v4956_v16 = vld [vmem:[%s6771_s1 + $0x620] ss:$12 sps:$4 sm:$0xff]  }
 0x125   :  { %4317 = vmatprep.subr.bf16.mxu1 %v4934_v8  ;;  %3310 = vmatprep.mubr.bf16.mxu0 %v5005_v25  ;;  %v4951_v4 = vld [vmem:[%s6771_s1 + $0x4b8] ss:$12 sps:$4 sm:$0xff]   ;;  %v4963_v25 = vld [vmem:[%s6771_s1 + $0x830] ss:$12 sps:$4 sm:$0xff]  }
 0x126   :  { %3374 = vmatprep.mubr.bf16.mxu1 %v5006_v30  ;;  %v4952_v8 = vld [vmem:[%s6771_s1 + $0x638] ss:$12 sps:$4 sm:$0xff]   ;;  %v4964_v30 = vld [vmem:[%s6771_s1 + $0x9b0] ss:$12 sps:$4 sm:$0xff]  }
 0x127   :  { %4278 = vmatpush3.bf16.msra.mxu0 %v4935_v12  ;;  %v4955_v12 = vld [vmem:[%s6771_s1 + $0x4a0] ss:$12 sps:$4 sm:$0xff]  }
 0x128   :  { %4318 = vmatpush3.bf16.msra.mxu1 %v4936_v21  ;;  %4279 = vmatprep.subr.bf16.mxu0 %v4937_v23  ;;  %v4960_v21 = vld [vmem:[%s6771_s1 + $0x608] ss:$12 sps:$4 sm:$0xff]   ;;  %v4961_v23 = vld [vmem:[%s6771_s1 + $0x8f0] ss:$12 sps:$4 sm:$0xff]  }
 0x129   :  { %4319 = vmatprep.subr.bf16.mxu1 %v4938_v24  ;;  %v5014_v24 = vld [vmem:[%s6772_s0 + $0x24] ss:$60 sps:$4 sm:$0xff]  }
 0x12a   :  { %3311 = vmatmul.mubr.bf16.gmra.mxu0 %v5007_v45  ;;  %v5015_v45 = vld [vmem:[%s6772_s0 + $0x18] ss:$60 sps:$4 sm:$0xff]  }
 0x12b   :  { %3375 = vmatmul.mubr.bf16.gmra.mxu1 %v5008_v46  ;;  %4280 = vmatpush3.bf16.msra.mxu0 %v4939_v31  ;;  %v4965_v31 = vld [vmem:[%s6771_s1 + $0x8d8] ss:$12 sps:$4 sm:$0xff]   ;;  %v5016_v46 = vld [vmem:[%s6772_s0 + $0x20] ss:$60 sps:$4 sm:$0xff]  }
 0x12c   :  { %4320 = vmatpush3.bf16.msra.mxu1 %v4940_v32  ;;  %4281 = vmatprep.subr.bf16.mxu0 %v4941_v40  ;;  %v4966_v32 = vld [vmem:[%s6771_s1 + $0xa58] ss:$12 sps:$4 sm:$0xff]  }
 0x12d   :  { %4321 = vmatprep.subr.bf16.mxu1 %v4942_v35  ;;  %3318 = vmatprep.mubr.bf16.mxu0 %v5009_v53 }
 0x12e   :  { %3382 = vmatprep.mubr.bf16.mxu1 %v5010_v54  ;;  %v4969_v54 = vld [vmem:[%s6771_s1 + $0x8c0] ss:$12 sps:$4 sm:$0xff]  }
 0x12f   :  { %4282 = vmatpush3.bf16.msra.mxu0 %v4943_v47 }
 0x130   :  { %4322 = vmatpush3.bf16.msra.mxu1 %v4944_v48  ;;  %4283 = vmatprep.subr.bf16.mxu0 %v4945_v49  ;;  %v4967_v48 = vld [vmem:[%s6771_s1 + $0x818] ss:$12 sps:$4 sm:$0xff]  }
 0x131   :  { %4323 = vmatprep.subr.bf16.mxu1 %v4946_v42  ;;  %v4968_v49 = vld [vmem:[%s6771_s1 + $0x998] ss:$12 sps:$4 sm:$0xff]  }
 0x132   :  { %3319 = vmatmul.mubr.bf16.gmra.mxu0 %v5011_v63 }
 0x133   :  { %3383 = vmatmul.mubr.bf16.gmra.mxu1 %v5012_v1  ;;  %4284 = vmatpush3.bf16.msra.mxu0 %v4947_v55 }
 0x134   :  { %4324 = vmatpush3.bf16.msra.mxu1 %v4948_v56  ;;  %4285 = vmatprep.subr.bf16.mxu0 %v4949_v57  ;;  %v5017_v57 = vld [vmem:[%s6772_s0 + $0x94] ss:$60 sps:$4 sm:$0xff]  }
 0x135   :  { %4325 = vmatprep.subr.bf16.mxu1 %v4950_v62  ;;  %3326 = vmatprep.mubr.bf16.mxu0 %v5366_v41  ;;  %v4958_v41 = vld [vmem:[%s6771_s1 + $0x6c8] ss:$12 sps:$4 sm:$0xff]   ;;  %v5018_v62 = vld [vmem:[%s6772_s0 + $0x9c] ss:$60 sps:$4 sm:$0xff]  }
 0x136   :  { %3390 = vmatprep.mubr.bf16.mxu1 %v5598_v58  ;;  %v4959_v58 = vld [vmem:[%s6771_s1 + $0x488] ss:$12 sps:$4 sm:$0xff]  }
 0x137   :  { %4286 = vmatpush3.bf16.msra.mxu0 %v4951_v4  ;;  %v2750_v4 = vadd.f32 %v6038_v37, %v6036_v36  ;;  %v4973_v36 = vld [vmem:[%s6771_s1 + $0x8a8] ss:$12 sps:$4 sm:$0xff]  }
 0x138   :  { %4326 = vmatpush3.bf16.msra.mxu1 %v4952_v8  ;;  %4287 = vmatprep.subr.bf16.mxu0 %v4953_v10 }
 0x139   :  { %4327 = vmatprep.subr.bf16.mxu1 %v4954_v11  ;;  %v4972_v11 = vld [vmem:[%s6771_s1 + $0x980] ss:$12 sps:$4 sm:$0xff]  }
 0x13a   :  { %3327 = vmatmul.mubr.bf16.gmra.mxu0 %v5370_v43  ;;  %v4962_v43 = vld [vmem:[%s6771_s1 + $0xa70] ss:$12 sps:$4 sm:$0xff]  }
 0x13b   :  { %3391 = vmatmul.mubr.bf16.gmra.mxu1 %v5616_v0  ;;  %4288 = vmatpush3.bf16.msra.mxu0 %v4955_v12  ;;  %v5013_v0 = vld [vmem:[%s6772_s0 + $0x1c] ss:$60 sps:$4 sm:$0xff]  }
 0x13c   :  { %4328 = vmatpush3.bf16.msra.mxu1 %v4956_v16  ;;  %4289 = vmatprep.subr.bf16.mxu0 %v4957_v17 }
 0x13d   :  { %4329 = vmatprep.subr.bf16.mxu1 %v4958_v41  ;;  %3430 = vmatprep.mubr.bf16.mxu0 %v5013_v0 }
 0x13e   :  { %3494 = vmatprep.mubr.bf16.mxu1 %v5014_v24  ;;  %v4975_v24 = vld [vmem:[%s6771_s1 + $0x7e8] ss:$12 sps:$4 sm:$0xff]  }
 0x13f   :  { %4290 = vmatpush3.bf16.msra.mxu0 %v4959_v58  ;;  %v5019_v58 = vld [vmem:[%s6772_s0 + $0x90] ss:$60 sps:$4 sm:$0xff]  }
 0x140   :  { %4330 = vmatpush3.bf16.msra.mxu1 %v4960_v21  ;;  %4355 = vmatprep.subr.bf16.mxu0 %v4961_v23  ;;  %v5020_v21 = vld [vmem:[%s6772_s0 + $0x98] ss:$60 sps:$4 sm:$0xff]  }
 0x141   :  { %4395 = vmatprep.subr.bf16.mxu1 %v4962_v43 }
 0x142   :  { %v2814_v40 = vpop.f32.mrf.mxu0  ;;  %3431 = vmatmul.mubr.bf16.vlgmr.msra.gmra.mxu0 %v5015_v45  ;;  %v5021_v45 = vld [vmem:[%s6772_s0 + $0x10c] ss:$60 sps:$4 sm:$0xff]  }
 0x143   :  { %v2885_v35 = vpop.f32.mrf.mxu1  ;;  %3495 = vmatmul.mubr.bf16.vlgmr.msra.gmra.mxu1 %v5016_v46  ;;  %v2815_v47 = vadd.f32 %v2814_v40, %v6006_v22  ;;  %4356 = vmatpush3.bf16.msra.mxu0 %v4963_v25  ;;  %v4970_v22 = vld [vmem:[%s6771_s1 + $0xa40] ss:$12 sps:$4 sm:$0xff]   ;;  %v4976_v25 = vld [vmem:[%s6771_s1 + $0x968] ss:$12 sps:$4 sm:$0xff]  }
 0x144   :  { %4396 = vmatpush3.bf16.msra.mxu1 %v4964_v30  ;;  %v2816_v42 = vpop.f32.mrf.mxu0  ;;  %4357 = vmatprep.subr.bf16.mxu0 %v4965_v31  ;;  %v5022_v46 = vld [vmem:[%s6772_s0 + $0x114] ss:$60 sps:$4 sm:$0xff]  }
 0x145   :  { %v2887_v53 = vpop.f32.mrf.mxu1  ;;  %4397 = vmatprep.subr.bf16.mxu1 %v4966_v32  ;;  %v6333_v55 = vadd.f32 %v2885_v35, %v2815_v47  ;;  %v2817_v56 = vadd.f32 %v2816_v42, %v6019_v28  ;;  %3438 = vmatprep.mubr.bf16.mxu0 %v5017_v57  ;;  %v4971_v28 = vld [vmem:[%s6771_s1 + $0x800] ss:$12 sps:$4 sm:$0xff]   ;;  %v4977_v32 = vld [vmem:[%s6771_s1 + $0x890] ss:$12 sps:$4 sm:$0xff]  }
 0x146   :  { %3502 = vmatprep.mubr.bf16.mxu1 %v5018_v62  ;;  %v2818_v63 = vpop.f32.mrf.mxu0 }
 0x147   :  { %v2889_v1 = vpop.f32.mrf.mxu1  ;;  %v6344_v8 = vadd.f32 %v2887_v53, %v2817_v56  ;;  %v2819_v10 = vadd.f32 %v2818_v63, %v6031_v34  ;;  %4358 = vmatpush3.bf16.msra.mxu0 %v4967_v48  ;;  %v4974_v34 = vld [vmem:[%s6771_s1 + $0xa28] ss:$12 sps:$4 sm:$0xff]   ;;  %v4979_v53 = vld [vmem:[%s6771_s1 + $0x7d0] ss:$12 sps:$4 sm:$0xff]  }
 0x148   :  { %4398 = vmatpush3.bf16.msra.mxu1 %v4968_v49  ;;  %v2820_v12 = vpop.f32.mrf.mxu0  ;;  %4359 = vmatprep.subr.bf16.mxu0 %v4969_v54  ;;  %v2760_v49 = vadd.f32 %v6096_v7, %v6094_v6  ;;  %v4980_v54 = vld [vmem:[%s6771_s1 + $0x950] ss:$12 sps:$4 sm:$0xff]   ;;  %v4982_v6 = vld [vmem:[%s6771_s1 + $0x9f8] ss:$12 sps:$4 sm:$0xff]  }
 0x149   :  { %v2891_v16 = vpop.f32.mrf.mxu1  ;;  %4399 = vmatprep.subr.bf16.mxu1 %v4970_v22  ;;  %v6359_v37 = vadd.f32 %v2889_v1, %v2819_v10  ;;  %v2821_v17 = vadd.f32 %v2820_v12, %v2750_v4  ;;  %v5023_v63 = vld [vmem:[%s6772_s0 + $0x108] ss:$60 sps:$4 sm:$0xff]   ;;  %v5024_v1 = vld [vmem:[%s6772_s0 + $0x110] ss:$60 sps:$4 sm:$0xff]  }
 0x14a   :  { %v2824_v41 = vpop.f32.mrf.mxu0  ;;  %3439 = vmatmul.mubr.bf16.gmra.mxu0 %v5019_v58  ;;  %v4984_v12 = vld [vmem:[%s6771_s1 + $0x938] ss:$12 sps:$4 sm:$0xff]  }
 0x14b   :  { %3503 = vmatmul.mubr.bf16.gmra.mxu1 %v5020_v21  ;;  %v2895_v23 = vpop.f32.mrf.mxu1  ;;  %v6367_v43 = vadd.f32 %v2891_v16, %v2821_v17  ;;  %v2825_v0 = vadd.f32 %v2824_v41, %v6061_v50  ;;  %4360 = vmatpush3.bf16.msra.mxu0 %v4971_v28  ;;  %v4978_v50 = vld [vmem:[%s6771_s1 + $0xa10] ss:$12 sps:$4 sm:$0xff]  }
 0x14c   :  { %4400 = vmatpush3.bf16.msra.mxu1 %v4972_v11  ;;  %v2826_v30 = vpop.f32.mrf.mxu0  ;;  %4361 = vmatprep.subr.bf16.mxu0 %v4973_v36  ;;  %v4983_v11 = vld [vmem:[%s6771_s1 + $0x7b8] ss:$12 sps:$4 sm:$0xff]  }
 0x14d   :  { %v2897_v31 = vpop.f32.mrf.mxu1  ;;  %4401 = vmatprep.subr.bf16.mxu1 %v4974_v34  ;;  %v2827_v40 = vadd.f32 %v2826_v30, %v6081_v60  ;;  %v6383_v35 = vadd.f32 %v2895_v23, %v2825_v0  ;;  %3446 = vmatprep.mubr.bf16.mxu0 %v5021_v45  ;;  %v4986_v34 = vld [vmem:[%s6771_s1 + $0x9e0] ss:$12 sps:$4 sm:$0xff]   ;;  %v2770_v23 = vadd.f32 %v6140_v39, %v6138_v38  ;;  %v4990_v38 = vld [vmem:[%s6771_s1 + $0x9c8] ss:$12 sps:$4 sm:$0xff]  }
 0x14e   :  { %3510 = vmatprep.mubr.bf16.mxu1 %v5022_v46  ;;  %v2828_v47 = vpop.f32.mrf.mxu0  ;;  %v4991_v45 = vld [vmem:[%s6771_s1 + $0x788] ss:$12 sps:$4 sm:$0xff]  }
 0x14f   :  { %v2899_v48 = vpop.f32.mrf.mxu1  ;;  %v2829_v42 = vadd.f32 %v2828_v47, %v6089_v2  ;;  %v6394_v60 = vadd.f32 %v2897_v31, %v2827_v40  ;;  %4362 = vmatpush3.bf16.msra.mxu0 %v4975_v24  ;;  %v4981_v2 = vld [vmem:[%s6771_s1 + $0x878] ss:$12 sps:$4 sm:$0xff]   ;;  %v4992_v46 = vld [vmem:[%s6771_s1 + $0x908] ss:$12 sps:$4 sm:$0xff]  }
 0x150   :  { %4402 = vmatpush3.bf16.msra.mxu1 %v4976_v25  ;;  %v2830_v22 = vpop.f32.mrf.mxu0  ;;  %4363 = vmatprep.subr.bf16.mxu0 %v4977_v32 }
 0x151   :  { %v2901_v56 = vpop.f32.mrf.mxu1  ;;  %4403 = vmatprep.subr.bf16.mxu1 %v4978_v50  ;;  %v2831_v7 = vadd.f32 %v2830_v22, %v2760_v49  ;;  %v6408_v57 = vadd.f32 %v2899_v48, %v2829_v42  ;;  %v5025_v49 = vld [vmem:[%s6772_s0 + $0x2c] ss:$60 sps:$4 sm:$0xff]   ;;  %v5026_v42 = vld [vmem:[%s6772_s0 + $0x34] ss:$60 sps:$4 sm:$0xff]  }
 0x152   :  { %v2834_v62 = vpop.f32.mrf.mxu0  ;;  %3447 = vmatmul.mubr.bf16.gmra.mxu0 %v5023_v63 }
 0x153   :  { %3511 = vmatmul.mubr.bf16.gmra.mxu1 %v5024_v1  ;;  %v2905_v4 = vpop.f32.mrf.mxu1  ;;  %v2835_v10 = vadd.f32 %v2834_v62, %v6113_v20  ;;  %v6417_v28 = vadd.f32 %v2901_v56, %v2831_v7  ;;  %4364 = vmatpush3.bf16.msra.mxu0 %v4979_v53  ;;  %v4985_v20 = vld [vmem:[%s6771_s1 + $0x860] ss:$12 sps:$4 sm:$0xff]  }
 0x154   :  { %4404 = vmatpush3.bf16.msra.mxu1 %v4980_v54  ;;  %v2836_v16 = vpop.f32.mrf.mxu0  ;;  %4365 = vmatprep.subr.bf16.mxu0 %v4981_v2  ;;  %v4994_v2 = vld [vmem:[%s6771_s1 + $0xa88] ss:$12 sps:$4 sm:$0xff]   ;;  %v5028_v7 = vld [vmem:[%s6772_s0 + $0xa4] ss:$60 sps:$4 sm:$0xff]  }
 0x155   :  { %v2907_v36 = vpop.f32.mrf.mxu1  ;;  %4405 = vmatprep.subr.bf16.mxu1 %v4982_v6  ;;  %v2837_v17 = vadd.f32 %v2836_v16, %v6123_v27  ;;  %v6432_v41 = vadd.f32 %v2905_v4, %v2835_v10  ;;  %3454 = vmatprep.mubr.bf16.mxu0 %v5600_v59  ;;  %v4987_v27 = vld [vmem:[%s6771_s1 + $0x7a0] ss:$12 sps:$4 sm:$0xff]   ;;  %v5027_v6 = vld [vmem:[%s6772_s0 + $0x28] ss:$60 sps:$4 sm:$0xff]  }
 0x156   :  { %3518 = vmatprep.mubr.bf16.mxu1 %v5823_v13  ;;  %v2838_v58 = vpop.f32.mrf.mxu0  ;;  %v4988_v59 = vld [vmem:[%s6771_s1 + $0x920] ss:$12 sps:$4 sm:$0xff]  }
 0x157   :  { %v2909_v21 = vpop.f32.mrf.mxu1  ;;  %v2839_v0 = vadd.f32 %v2838_v58, %v6133_v33  ;;  %v6439_v24 = vadd.f32 %v2907_v36, %v2837_v17  ;;  %4366 = vmatpush3.bf16.msra.mxu0 %v4983_v11  ;;  %v4989_v33 = vld [vmem:[%s6771_s1 + $0x848] ss:$12 sps:$4 sm:$0xff]   ;;  %v5029_v62 = vld [vmem:[%s6772_s0 + $0xa0] ss:$60 sps:$4 sm:$0xff]  }
 0x158   :  { %4406 = vmatpush3.bf16.msra.mxu1 %v4984_v12  ;;  %v2840_v13 = vpop.f32.mrf.mxu0  ;;  %4367 = vmatprep.subr.bf16.mxu0 %v4985_v20 }
 0x159   :  { %v2911_v25 = vpop.f32.mrf.mxu1  ;;  %4407 = vmatprep.subr.bf16.mxu1 %v4986_v34  ;;  %v2841_v39 = vadd.f32 %v2840_v13, %v2770_v23  ;;  %v6453_v30 = vadd.f32 %v2909_v21, %v2839_v0 }
 0x15a   :  { %v2844_v31 = vpop.f32.mrf.mxu0  ;;  %3455 = vmatmul.mubr.bf16.gmra.mxu0 %v5624_v3  ;;  %v4993_v3 = vld [vmem:[%s6771_s1 + $0xaa0] ss:$12 sps:$4 sm:$0xff]  }
 0x15b   :  { %3519 = vmatmul.mubr.bf16.gmra.mxu1 %v5838_v18  ;;  %v2915_v32 = vpop.f32.mrf.mxu1  ;;  %v2845_v50 = vadd.f32 %v2844_v31, %v6153_v52  ;;  %v6458_v40 = vadd.f32 %v2911_v25, %v2841_v39  ;;  %4368 = vmatpush3.bf16.msra.mxu0 %v4987_v27 }
 0x15c   :  { %4408 = vmatpush3.bf16.msra.mxu1 %v4988_v59  ;;  %v2846_v47 = vpop.f32.mrf.mxu0  ;;  %4369 = vmatprep.subr.bf16.mxu0 %v4989_v33 }
 0x15d   :  { %v2917_v48 = vpop.f32.mrf.mxu1  ;;  %4409 = vmatprep.subr.bf16.mxu1 %v4990_v38  ;;  %v2847_v18 = vadd.f32 %v2846_v47, %v6167_v61  ;;  %v6470_v52 = vadd.f32 %v2915_v32, %v2845_v50  ;;  %3558 = vmatprep.mubr.bf16.mxu0 %v5025_v49 }
 0x15e   :  { %3622 = vmatprep.mubr.bf16.mxu1 %v5026_v42  ;;  %v2848_v53 = vpop.f32.mrf.mxu0 }
 0x15f   :  { %v2919_v54 = vpop.f32.mrf.mxu1  ;;  %v6478_v22 = vadd.f32 %v2917_v48, %v2847_v18  ;;  %4370 = vmatpush3.bf16.msra.mxu0 %v4991_v45 }
 0x160   :  { %4410 = vmatpush3.bf16.msra.mxu1 %v4992_v46  ;;  %4441 = vmatprep.subr.bf16.mxu0 %v4993_v3  ;;  %v2849_v61 = vpop.f32.mrf.mxu0 }
 0x161   :  { %4453 = vmatprep.subr.bf16.mxu1 %v4993_v3  ;;  %v2920_v56 = vpop.f32.mrf.mxu1 }
 0x162   :  { %3559 = vmatmul.mubr.bf16.vlgmr.msra.gmra.mxu0 %v5027_v6 }
 0x163   :  { %3623 = vmatmul.mubr.bf16.vlgmr.msra.gmra.mxu1 %v5971_v5  ;;  %4442 = vmatpush3.bf16.msra.mxu0 %v4993_v3  ;;  %v5030_v5 = vld [vmem:[%s6772_s0 + $0x11c] ss:$60 sps:$4 sm:$0xff]  }
 0x164   :  { %4455 = vmatpush3.bf16.msra.mxu1 %v4993_v3  ;;  %3566 = vmatprep.mubr.bf16.mxu0 %v5028_v7 }
 0x165   :  { %3630 = vmatprep.mubr.bf16.mxu1 %v5997_v14  ;;  %4443 = vmatprep.subr.bf16.mxu0 %v4994_v2  ;;  %v5031_v14 = vld [vmem:[%s6772_s0 + $0x118] ss:$60 sps:$4 sm:$0xff]  }
 0x166   :  { %4454 = vmatprep.subr.bf16.mxu1 %v4994_v2 }
 0x167   :  { %4444 = vmatpush3.bf16.msra.mxu0 %v4994_v2 }
 0x168   :  { %4456 = vmatpush3.bf16.msra.mxu1 %v4994_v2 }
 0x16a   :  { %3567 = vmatmul.mubr.bf16.gmra.mxu0 %v5029_v62 }
 0x16b   :  { %3631 = vmatmul.mubr.bf16.gmra.mxu1 %v6014_v26  ;;  %3574 = vmatprep.mubr.bf16.mxu0 %v5030_v5  ;;  %v5032_v26 = vld [vmem:[%s6772_s0 + $0x38] ss:$60 sps:$4 sm:$0xff]  }
 0x16c   :  { %3638 = vmatprep.mubr.bf16.mxu1 %v6049_v44  ;;  %v5033_v44 = vld [vmem:[%s6772_s0 + $0x128] ss:$60 sps:$4 sm:$0xff]  }
 0x172   :  { %3575 = vmatmul.mubr.bf16.gmra.mxu0 %v5031_v14 }
 0x173   :  { %3639 = vmatmul.mubr.bf16.gmra.mxu1 %v6066_v51  ;;  %3582 = vmatprep.mubr.bf16.mxu0 %v5828_v15 }
 0x174   :  { %3646 = vmatprep.mubr.bf16.mxu1 %v6101_v9  ;;  %v5035_v9 = vld [vmem:[%s6772_s0 + $0x1a0] ss:$0 sps:$4 sm:$0x11]  }
 0x17a   :  { %3583 = vmatmul.mubr.bf16.gmra.mxu0 %v5840_v19  ;;  %v5034_v19 = vld [vmem:[%s6772_s0 + $0xb0] ss:$60 sps:$4 sm:$0xff]  }
 0x17b   :  { %3647 = vmatmul.mubr.bf16.gmra.mxu1 %v6125_v29  ;;  %4445 = vmatprep.mubr.msk.bf16.mxu0 %vm2625_vm0, %v5032_v26 }
 0x17c   :  { %4449 = vmatprep.mubr.msk.bf16.mxu1 %vm2625_vm0, %v5033_v44 }
 0x182   :  { %v2956_v51 = vpop.f32.mrf.mxu0  ;;  %4446 = vmatmul.mubr.msk.bf16.vlgmr.msra.gmra.mxu0 %vm2625_vm0, %v5034_v19 }
 0x183   :  { %v3027_v15 = vpop.f32.mrf.mxu1  ;;  %4450 = vmatmul.mubr.msk.bf16.vlgmr.msra.gmra.mxu1 %vm2625_vm0, %v5035_v9  ;;  %v2957_v26 = vadd.f32 %v2956_v51, %v6333_v55 }
 0x184   :  { %v2958_v29 = vpop.f32.mrf.mxu0 }
 0x185   :  { %v3029_v63 = vpop.f32.mrf.mxu1  ;;  %v2959_v19 = vadd.f32 %v2958_v29, %v6344_v8 }
 0x186   :  { %v2960_v1 = vpop.f32.mrf.mxu0 }
 0x187   :  { %v3031_v4 = vpop.f32.mrf.mxu1  ;;  %v2961_v9 = vadd.f32 %v2960_v1, %v6359_v37 }
 0x188   :  { %v2962_v10 = vpop.f32.mrf.mxu0 }
 0x189   :  { %v3033_v11 = vpop.f32.mrf.mxu1 }
 0x18a   :  { %v2966_v12 = vpop.f32.mrf.mxu0 }
 0x18b   :  { %v6523_v16 = vpop.f32.mrf.mxu1 }
 0x18c   :  { %v2968_v36 = vpop.f32.mrf.mxu0 }
 0x18d   :  { %v6525_v20 = vpop.f32.mrf.mxu1 }
 0x18e   :  { %v2970_v34 = vpop.f32.mrf.mxu0 }
 0x18f   :  { %v6527_v17 = vpop.f32.mrf.mxu1  ;;  %v2971_v1 = vadd.f32 %v2970_v34, %v6408_v57 }
 0x190   :  { %v6529_v58 = vpop.f32.mrf.mxu0 }
 0x191   :  { %v6531_v21 = vpop.f32.mrf.mxu1  ;;  %v3042_v34 = vadd.f32 %v6527_v17, %v2971_v1 }
 0x192   :  { %v6533_v23 = vpop.f32.mrf.mxu0 }
 0x193   :  { %v6535_v0 = vpop.f32.mrf.mxu1 }
 0x194   :  { %v6537_v27 = vpop.f32.mrf.mxu0 }
 0x195   :  { %v6539_v59 = vpop.f32.mrf.mxu1  ;;  %v2979_v17 = vadd.f32 %v6537_v27, %v6439_v24 }
 0x196   :  { %v6541_v13 = vpop.f32.mrf.mxu0 }
 0x197   :  { %v6543_v25 = vpop.f32.mrf.mxu1 }
 0x198   :  { %v6545_v33 = vpop.f32.mrf.mxu0 }
 0x199   :  { %v6547_v38 = vpop.f32.mrf.mxu1 }
 0x19a   :  { %v6549_v39 = vpop.f32.mrf.mxu0 }
 0x19b   :  { %v6551_v31 = vpop.f32.mrf.mxu1 }
 0x19c   :  { %6774 = vst [vmem:[#allocation2_spill] sm:$0xff] %v6551_v31  ;;  %v6553_v32 = vpop.f32.mrf.mxu0 }
 0x19d   :  { %6775 = vst [vmem:[#allocation3_spill] sm:$0xff] %v6553_v32  ;;  %v6555_v50 = vpop.f32.mrf.mxu1 }
 0x19e   :  { %6776 = vst [vmem:[#allocation4_spill] sm:$0xff] %v6555_v50  ;;  %v2990_v46 = vpop.f32.mrf.mxu0  ;;  %v3030_v50 = vadd.f32 %v3029_v63, %v2959_v19 }
 0x19f   :  { %v3061_v45 = vpop.f32.mrf.mxu1  ;;  %v3028_v46 = vadd.f32 %v3027_v15, %v2957_v26  ;;  %v2969_v15 = vadd.f32 %v2968_v36, %v6394_v60 }
 0x1a0   :  { %v2991_v48 = vpop.f32.mrf.mxu0 }
 0x1a1   :  { %v3062_v47 = vpop.f32.mrf.mxu1 }
 0x1a3   :  { %v3169_v3 = vpop.f32.mrf.mxu1 }
 0x1a5   :  { %v3171_v18 = vpop.f32.mrf.mxu1 }
 0x1a7   :  { %v3173_v49 = vpop.f32.mrf.mxu1 }
 0x1a9   :  { %v3175_v42 = vpop.f32.mrf.mxu1 }
 0x1ab   :  { %v3179_v53 = vpop.f32.mrf.mxu1 }
 0x1ad   :  { %v6557_v54 = vpop.f32.mrf.mxu1 }
 0x1af   :  { %v6559_v61 = vpop.f32.mrf.mxu1 }
 0x1b1   :  { %v6561_v56 = vpop.f32.mrf.mxu1 }
 0x1b3   :  { %v6563_v2 = vpop.f32.mrf.mxu1 }
 0x1b5   :  { %v6565_v6 = vpop.f32.mrf.mxu1 }
 0x1b6   :  { %6777 = vst [vmem:[#allocation5_spill] sm:$0xff] %v6565_v6 }
 0x1b7   :  { %v6567_v7 = vpop.f32.mrf.mxu1 }
 0x1b8   :  { %6778 = vst [vmem:[#allocation6_spill] sm:$0xff] %v6567_v7  ;;  %v2963_v7 = vadd.f32 %v2962_v10, %v6367_v43 }
 0x1b9   :  { %v6569_v62 = vpop.f32.mrf.mxu1 }
 0x1ba   :  { %6779 = vst [vmem:[#allocation7_spill] sm:$0xff] %v6569_v62  ;;  %v3032_v62 = vadd.f32 %v3031_v4, %v2961_v9  ;;  %v3034_v37 = vadd.f32 %v3033_v11, %v2963_v7 }
 0x1bb   :  { %v6571_v5 = vpop.f32.mrf.mxu1 }
 0x1bc   :  { %6780 = vst [vmem:[#allocation8_spill] sm:$0xff] %v6571_v5 }
 0x1bd   :  { %v6573_v14 = vpop.f32.mrf.mxu1 }
 0x1be   :  { %6781 = vst [vmem:[#allocation9_spill] sm:$0xff] %v6573_v14  ;;  %v2967_v14 = vadd.f32 %v2966_v12, %v6383_v35 }
 0x1bf   :  { %v3203_v44 = vpop.f32.mrf.mxu1 }
 0x1c0   :  { %v3038_v35 = vadd.f32 %v6523_v16, %v2967_v14 }
 0x1c1   :  { %v3204_v45 = vpop.f32.mrf.mxu1 }
 0x1c2   :  { %v3098_v47 = vpop.f32.mrf.mxu0  ;;  %v2987_v45 = vadd.f32 %v6549_v39, %v6470_v52  ;;  %v6783_v52 = vld [vmem:[#allocation5_spill] sm:$0xff] }
 0x1c3   :  { %v4171_v48 = vpop.f32.mrf.mxu1  ;;  %v3099_v31 = vadd.f32 %v3098_v47, %v3028_v46 }
 0x1c4   :  { %v3100_v6 = vpop.f32.mrf.mxu0 }
 0x1c5   :  { %v4172_v5 = vpop.f32.mrf.mxu1  ;;  %v3170_v32 = vadd.f32 %v3169_v3, %v3099_v31  ;;  %v3101_v55 = vadd.f32 %v3100_v6, %v3030_v50  ;;  %v2973_v50 = vadd.f32 %v6529_v58, %v6417_v28 }
 0x1c6   :  { %v6580_v51 = vadd.f32 %v4172_v5, %v4171_v48  ;;  %v3102_v8 = vpop.f32.mrf.mxu0 }
 0x1c7   :  { %v4174_v29 = vpop.f32.mrf.mxu1  ;;  %3718 = vst [vmem:[%s6773_s2] sm:$0xff] %v3170_v32  ;;  %v3172_v43 = vadd.f32 %v3171_v18, %v3101_v55  ;;  %v3103_v63 = vadd.f32 %v3102_v8, %v3032_v62  ;;  %v3040_v32 = vadd.f32 %v6525_v20, %v2969_v15  ;;  %v6785_v15 = vld [vmem:[#allocation6_spill] sm:$0xff] }
 0x1c8   :  { %v3104_v4 = vpop.f32.mrf.mxu0 }
 0x1c9   :  { %v4175_v10 = vpop.f32.mrf.mxu1  ;;  %3719 = vst [vmem:[%s6773_s2 + $0x8] sm:$0xff] %v3172_v43  ;;  %v3174_v12 = vadd.f32 %v3173_v49, %v3103_v63  ;;  %v3105_v11 = vadd.f32 %v3104_v4, %v3034_v37  ;;  %v2977_v49 = vadd.f32 %v6533_v23, %v6432_v41  ;;  %v6786_v4 = vld [vmem:[#allocation4_spill] sm:$0xff] }
 0x1ca   :  { %v6591_v31 = vadd.f32 %v4175_v10, %v4174_v29  ;;  %v3108_v60 = vpop.f32.mrf.mxu0 }
 0x1cb   :  { %v4177_v36 = vpop.f32.mrf.mxu1  ;;  %3722 = vst [vmem:[%s6773_s2 + $0x18] sm:$0xff] %v3174_v12  ;;  %v3176_v57 = vadd.f32 %v3175_v42, %v3105_v11  ;;  %v3109_v16 = vadd.f32 %v3108_v60, %v3038_v35  ;;  %v3044_v42 = vadd.f32 %v6531_v21, %v2973_v50  ;;  %v3048_v14 = vadd.f32 %v6535_v0, %v2977_v49  ;;  %v6787_v35 = vld [vmem:[#allocation7_spill] sm:$0xff] }
 0x1cc   :  { %v3110_v3 = vpop.f32.mrf.mxu0 }
 0x1cd   :  { %v4178_v18 = vpop.f32.mrf.mxu1  ;;  %3723 = vst [vmem:[%s6773_s2 + $0x20] sm:$0xff] %v3176_v57  ;;  %v3180_v20 = vadd.f32 %v3179_v53, %v3109_v16  ;;  %v3111_v6 = vadd.f32 %v3110_v3, %v3040_v32  ;;  %v2981_v53 = vadd.f32 %v6541_v13, %v6453_v30  ;;  %v2983_v30 = vadd.f32 %v6545_v33, %v6458_v40  ;;  %v6788_v32 = vld [vmem:[#allocation8_spill] sm:$0xff] }
 0x1ce   :  { %v6605_v28 = vadd.f32 %v4178_v18, %v4177_v36  ;;  %v3112_v58 = vpop.f32.mrf.mxu0  ;;  %v6789_v18 = vld [vmem:[#allocation9_spill] sm:$0xff] }
 0x1cf   :  { %v4180_v7 = vpop.f32.mrf.mxu1  ;;  %3725 = vst [vmem:[%s6773_s2 + $0x30] sm:$0xff] %v3180_v20  ;;  %v3182_v41 = vadd.f32 %v6557_v54, %v3111_v6  ;;  %v3113_v23 = vadd.f32 %v3112_v58, %v3042_v34  ;;  %v3050_v54 = vadd.f32 %v6539_v59, %v2979_v17  ;;  %v3052_v19 = vadd.f32 %v6543_v25, %v2981_v53  ;;  %v6782_v25 = vld [vmem:[#allocation3_spill] sm:$0xff] }
 0x1d0   :  { %v3114_v62 = vpop.f32.mrf.mxu0  ;;  %v2989_v48 = vadd.f32 %v6782_v25, %v6478_v22 }
 0x1d1   :  { %v4181_v5 = vpop.f32.mrf.mxu1  ;;  %3726 = vst [vmem:[%s6773_s2 + $0x38] sm:$0xff] %v3182_v41  ;;  %v3184_v24 = vadd.f32 %v6559_v61, %v3113_v23  ;;  %v3115_v21 = vadd.f32 %v3114_v62, %v3044_v42 }
 0x1d2   :  { %v6621_v27 = vadd.f32 %v4181_v5, %v4180_v7  ;;  %v3118_v26 = vpop.f32.mrf.mxu0  ;;  %v3060_v10 = vadd.f32 %v6786_v4, %v2989_v48 }
 0x1d3   :  { %v4183_v44 = vpop.f32.mrf.mxu1  ;;  %3728 = vst [vmem:[%s6773_s2 + $0x48] sm:$0xff] %v3184_v24  ;;  %v3186_v0 = vadd.f32 %v6561_v56, %v3115_v21  ;;  %v3119_v13 = vadd.f32 %v3118_v26, %v3048_v14  ;;  %v3054_v56 = vadd.f32 %v6547_v38, %v2983_v30 }
 0x1d4   :  { %v3120_v61 = vpop.f32.mrf.mxu0 }
 0x1d5   :  { %v4184_v9 = vpop.f32.mrf.mxu1  ;;  %3729 = vst [vmem:[%s6773_s2 + $0x50] sm:$0xff] %v3186_v0  ;;  %v3190_v40 = vadd.f32 %v6563_v2, %v3119_v13  ;;  %v3121_v59 = vadd.f32 %v3120_v61, %v3050_v54  ;;  %v6784_v2 = vld [vmem:[#allocation2_spill] sm:$0xff] }
 0x1d6   :  { %v6637_v33 = vadd.f32 %v4184_v9, %v4183_v44  ;;  %v3122_v46 = vpop.f32.mrf.mxu0  ;;  %v3058_v37 = vadd.f32 %v6784_v2, %v2987_v45 }
 0x1d7   :  { %v4186_v47 = vpop.f32.mrf.mxu1  ;;  %3731 = vst [vmem:[%s6773_s2 + $0x60] sm:$0xff] %v3190_v40  ;;  %v3192_v39 = vadd.f32 %v6783_v52, %v3121_v59  ;;  %v3123_v55 = vadd.f32 %v3122_v46, %v3052_v19 }
 0x1d8   :  { %v3124_v8 = vpop.f32.mrf.mxu0 }
 0x1d9   :  { %v4187_v29 = vpop.f32.mrf.mxu1  ;;  %3732 = vst [vmem:[%s6773_s2 + $0x68] sm:$0xff] %v3192_v39  ;;  %v3194_v38 = vadd.f32 %v6785_v15, %v3123_v55  ;;  %v3125_v43 = vadd.f32 %v3124_v8, %v3054_v56 }
 0x1da   :  { %v6651_v63 = vadd.f32 %v4187_v29, %v4186_v47  ;;  %v3128_v22 = vpop.f32.mrf.mxu0 }
 0x1db   :  { %v4189_v1 = vpop.f32.mrf.mxu1  ;;  %3734 = vst [vmem:[%s6773_s2 + $0x78] sm:$0xff] %v3194_v38  ;;  %v3196_v12 = vadd.f32 %v6787_v35, %v3125_v43  ;;  %v3129_v11 = vadd.f32 %v3128_v22, %v3058_v37 }
 0x1dc   :  { %v3130_v60 = vpop.f32.mrf.mxu0 }
 0x1dd   :  { %v4190_v36 = vpop.f32.mrf.mxu1  ;;  %3735 = vst [vmem:[%s6773_s2 + $0x80] sm:$0xff] %v3196_v12  ;;  %v3200_v50 = vadd.f32 %v6788_v32, %v3129_v11  ;;  %v3131_v57 = vadd.f32 %v3130_v60, %v3060_v10 }
 0x1de   :  { %v6662_v16 = vadd.f32 %v4190_v36, %v4189_v1  ;;  %v3132_v34 = vpop.f32.mrf.mxu0 }
 0x1df   :  { %v4192_v3 = vpop.f32.mrf.mxu1  ;;  %3737 = vst [vmem:[%s6773_s2 + $0x90] sm:$0x1] %v3200_v50  ;;  %v3202_v49 = vadd.f32 %v6789_v18, %v3131_v57 }
 0x1e0   :  { %v3133_v20 = vpop.f32.mrf.mxu0 }
 0x1e1   :  { %v4193_v6 = vpop.f32.mrf.mxu1  ;;  %3738 = vst [vmem:[%s6773_s2 + $0x98] sm:$0x1] %v3202_v49 }
 0x1e2   :  { %v4211_v58 = vpop.f32.mrf.mxu0 }
 0x1e3   :  { %v4251_v7 = vpop.f32.mrf.mxu1 }
 0x1e4   :  { %v4212_v42 = vpop.f32.mrf.mxu0 }
 0x1e5   :  { %v4252_v17 = vpop.f32.mrf.mxu1  ;;  %v4213_v41 = vadd.f32 %v4212_v42, %v4211_v58 }
 0x1e6   :  { %v4253_v23 = vadd.f32 %v4252_v17, %v4251_v7  ;;  %v4214_v53 = vpop.f32.mrf.mxu0 }
 0x1e7   :  { %v4254_v62 = vpop.f32.mrf.mxu1  ;;  %v3305_v5 = vadd.f32 %v4213_v41, %v6580_v51 }
 0x1e8   :  { %v4215_v14 = vpop.f32.mrf.mxu0 }
 0x1e9   :  { %v4255_v24 = vpop.f32.mrf.mxu1  ;;  %v6672_v21 = vadd.f32 %v4253_v23, %v3305_v5  ;;  %v4216_v26 = vadd.f32 %v4215_v14, %v4214_v53 }
 0x1ea   :  { %v4256_v44 = vadd.f32 %v4255_v24, %v4254_v62  ;;  %v4217_v54 = vpop.f32.mrf.mxu0 }
 0x1eb   :  { %v4257_v30 = vpop.f32.mrf.mxu1  ;;  %v3308_v0 = vadd.f32 %v4216_v26, %v6591_v31 }
 0x1ec   :  { %v4218_v13 = vpop.f32.mrf.mxu0 }
 0x1ed   :  { %v4258_v19 = vpop.f32.mrf.mxu1  ;;  %v6675_v61 = vadd.f32 %v4256_v44, %v3308_v0  ;;  %v4219_v9 = vadd.f32 %v4218_v13, %v4217_v54 }
 0x1ee   :  { %v4259_v45 = vadd.f32 %v4258_v19, %v4257_v30  ;;  %v4220_v40 = vpop.f32.mrf.mxu0 }
 0x1ef   :  { %v4260_v59 = vpop.f32.mrf.mxu1  ;;  %v3313_v51 = vadd.f32 %v4219_v9, %v6605_v28 }
 0x1f0   :  { %v4221_v46 = vpop.f32.mrf.mxu0 }
 0x1f1   :  { %v4261_v47 = vpop.f32.mrf.mxu1  ;;  %v6678_v56 = vadd.f32 %v4259_v45, %v3313_v51  ;;  %v4222_v25 = vadd.f32 %v4221_v46, %v4220_v40 }
 0x1f2   :  { %v4262_v48 = vadd.f32 %v4261_v47, %v4260_v59  ;;  %v4223_v52 = vpop.f32.mrf.mxu0 }
 0x1f3   :  { %v4263_v39 = vpop.f32.mrf.mxu1  ;;  %v3316_v31 = vadd.f32 %v4222_v25, %v6621_v27 }
 0x1f4   :  { %v4224_v55 = vpop.f32.mrf.mxu0 }
 0x1f5   :  { %v4264_v8 = vpop.f32.mrf.mxu1  ;;  %v6681_v29 = vadd.f32 %v4262_v48, %v3316_v31  ;;  %v4225_v2 = vadd.f32 %v4224_v55, %v4223_v52 }
 0x1f6   :  { %v4265_v37 = vadd.f32 %v4264_v8, %v4263_v39  ;;  %v4226_v15 = vpop.f32.mrf.mxu0 }
 0x1f7   :  { %v4266_v38 = vpop.f32.mrf.mxu1  ;;  %v3321_v28 = vadd.f32 %v4225_v2, %v6637_v33 }
 0x1f8   :  { %v4227_v43 = vpop.f32.mrf.mxu0 }
 0x1f9   :  { %v4267_v22 = vpop.f32.mrf.mxu1  ;;  %v6684_v1 = vadd.f32 %v4265_v37, %v3321_v28  ;;  %v4228_v4 = vadd.f32 %v4227_v43, %v4226_v15 }
 0x1fa   :  { %v4268_v10 = vadd.f32 %v4267_v22, %v4266_v38  ;;  %v4229_v35 = vpop.f32.mrf.mxu0 }
 0x1fb   :  { %v6686_v12 = vpop.f32.mrf.mxu1  ;;  %v3324_v27 = vadd.f32 %v4228_v4, %v6651_v63 }
 0x1fc   :  { %v4230_v11 = vpop.f32.mrf.mxu0 }
 0x1fd   :  { %v6689_v60 = vpop.f32.mrf.mxu1  ;;  %v6691_v36 = vadd.f32 %v4268_v10, %v3324_v27  ;;  %v4231_v4 = vadd.f32 %v4230_v11, %v4229_v35 }
 0x1fe   :  { %v4232_v32 = vpop.f32.mrf.mxu0 }
 0x1ff   :  { %v4272_v50 = vpop.f32.mrf.mxu1 }
 0x200   :  { %v4233_v57 = vpop.f32.mrf.mxu0 }
 0x201   :  { %v4273_v33 = vpop.f32.mrf.mxu1 }
 0x202   :  { %v4291_v34 = vpop.f32.mrf.mxu0  ;;  %v3329_v33 = vadd.f32 %v4231_v4, %v6662_v16 }
 0x203   :  { %v6693_v3 = vpop.f32.mrf.mxu1 }
 0x204   :  { %v4292_v18 = vpop.f32.mrf.mxu0 }
 0x205   :  { %v4332_v49 = vpop.f32.mrf.mxu1  ;;  %v4293_v32 = vadd.f32 %v4292_v18, %v4291_v34 }
 0x206   :  { %v4294_v20 = vpop.f32.mrf.mxu0  ;;  %v4333_v34 = vadd.f32 %v4332_v49, %v6693_v3 }
 0x207   :  { %v6695_v6 = vpop.f32.mrf.mxu1 }
 0x208   :  { %v4295_v58 = vpop.f32.mrf.mxu0 }
 0x209   :  { %v6697_v7 = vpop.f32.mrf.mxu1  ;;  %v4296_v16 = vadd.f32 %v4295_v58, %v4294_v20 }
 0x20a   :  { %v4297_v63 = vpop.f32.mrf.mxu0 }
 0x20b   :  { %v6699_v42 = vpop.f32.mrf.mxu1  ;;  %v3436_v58 = vadd.f32 %v4296_v16, %v6675_v61 }
 0x20c   :  { %v4298_v17 = vpop.f32.mrf.mxu0 }
 0x20d   :  { %v4338_v41 = vpop.f32.mrf.mxu1 }
 0x20e   :  { %v4300_v23 = vpop.f32.mrf.mxu0 }
 0x20f   :  { %v6701_v53 = vpop.f32.mrf.mxu1 }
 0x210   :  { %v4301_v62 = vpop.f32.mrf.mxu0 }
 0x211   :  { %v4341_v5 = vpop.f32.mrf.mxu1 }
 0x212   :  { %v4303_v14 = vpop.f32.mrf.mxu0 }
 0x213   :  { %v4343_v24 = vpop.f32.mrf.mxu1 }
 0x214   :  { %v4304_v26 = vpop.f32.mrf.mxu0 }
 0x215   :  { %v4344_v44 = vpop.f32.mrf.mxu1 }
 0x216   :  { %v4306_v54 = vpop.f32.mrf.mxu0 }
 0x217   :  { %v6703_v30 = vpop.f32.mrf.mxu1 }
 0x218   :  { %v4307_v0 = vpop.f32.mrf.mxu0 }
 0x219   :  { %v6705_v13 = vpop.f32.mrf.mxu1 }
 0x21a   :  { %v4309_v19 = vpop.f32.mrf.mxu0 }
 0x21b   :  { %v4349_v9 = vpop.f32.mrf.mxu1 }
 0x21c   :  { %v4310_v45 = vpop.f32.mrf.mxu0 }
 0x21d   :  { %v4350_v40 = vpop.f32.mrf.mxu1 }
 0x21e   :  { %v4312_v59 = vpop.f32.mrf.mxu0  ;;  %v4351_v20 = vadd.f32 %v4350_v40, %v4349_v9 }
 0x21f   :  { %v4352_v51 = vpop.f32.mrf.mxu1  ;;  %v4299_v59 = vadd.f32 %v4298_v17, %v4297_v63 }
 0x220   :  { %v4313_v46 = vpop.f32.mrf.mxu0  ;;  %v4302_v51 = vadd.f32 %v4301_v62, %v4300_v23  ;;  %v4308_v23 = vadd.f32 %v4307_v0, %v4306_v54 }
 0x221   :  { %v4353_v47 = vpop.f32.mrf.mxu1  ;;  %v4305_v46 = vadd.f32 %v4304_v26, %v4303_v14  ;;  %v3441_v18 = vadd.f32 %v4299_v59, %v6678_v56  ;;  %v4336_v56 = vadd.f32 %v6697_v7, %v6695_v6 }
 0x222   :  { %v4371_v25 = vpop.f32.mrf.mxu0  ;;  %v3444_v63 = vadd.f32 %v4302_v51, %v6681_v29 }
 0x223   :  { %v6707_v48 = vpop.f32.mrf.mxu1  ;;  %v3449_v17 = vadd.f32 %v4305_v46, %v6684_v1  ;;  %v3500_v4 = vadd.f32 %v4336_v56, %v3436_v58 }
 0x224   :  { %v4372_v52 = vpop.f32.mrf.mxu0 }
 0x225   :  { %v6709_v39 = vpop.f32.mrf.mxu1 }
 0x226   :  { %6790 = vst [vmem:[#allocation3_spill] sm:$0xff] %v6709_v39  ;;  %v4374_v31 = vpop.f32.mrf.mxu0  ;;  %v4311_v39 = vadd.f32 %v4310_v45, %v4309_v19  ;;  %v4342_v19 = vadd.f32 %v4341_v5, %v6701_v53  ;;  %v4345_v45 = vadd.f32 %v4344_v44, %v4343_v24  ;;  %v4348_v44 = vadd.f32 %v6705_v13, %v6703_v30 }
 0x227   :  { %v6711_v55 = vpop.f32.mrf.mxu1 }
 0x228   :  { %6791 = vst [vmem:[#allocation5_spill] sm:$0xff] %v6711_v55  ;;  %v4375_v8 = vpop.f32.mrf.mxu0  ;;  %v4271_v55 = vadd.f32 %v6689_v60, %v6686_v12  ;;  %v4339_v12 = vadd.f32 %v4338_v41, %v6699_v42  ;;  %v3508_v54 = vadd.f32 %v4342_v19, %v3444_v63  ;;  %v3513_v0 = vadd.f32 %v4345_v45, %v3449_v17 }
 0x229   :  { %v6713_v2 = vpop.f32.mrf.mxu1  ;;  %v3452_v42 = vadd.f32 %v4308_v23, %v6691_v36  ;;  %v4376_v6 = vadd.f32 %v4375_v8, %v4374_v31 }
 0x22a   :  { %6792 = vst [vmem:[#allocation2_spill] sm:$0xff] %v6713_v2  ;;  %v4377_v37 = vpop.f32.mrf.mxu0  ;;  %v3505_v29 = vadd.f32 %v4339_v12, %v3441_v18 }
 0x22b   :  { %v4417_v15 = vpop.f32.mrf.mxu1  ;;  %v3516_v36 = vadd.f32 %v4348_v44, %v3452_v42  ;;  %v3564_v31 = vadd.f32 %v4376_v6, %v3500_v4 }
 0x22c   :  { %v4378_v38 = vpop.f32.mrf.mxu0 }
 0x22d   :  { %v4418_v28 = vpop.f32.mrf.mxu1 }
 0x22e   :  { %v4380_v43 = vpop.f32.mrf.mxu0  ;;  %v4419_v7 = vadd.f32 %v4418_v28, %v4417_v15 }
 0x22f   :  { %v6715_v22 = vpop.f32.mrf.mxu1 }
 0x230   :  { %6793 = vst [vmem:[#allocation6_spill] sm:$0xff] %v6715_v22  ;;  %v4381_v10 = vpop.f32.mrf.mxu0  ;;  %v3433_v22 = vadd.f32 %v4293_v32, %v6672_v21  ;;  %v4379_v21 = vadd.f32 %v4378_v38, %v4377_v37 }
 0x231   :  { %v6717_v27 = vpop.f32.mrf.mxu1  ;;  %v4382_v5 = vadd.f32 %v4381_v10, %v4380_v43  ;;  %v6799_v16 = vld [vmem:[#allocation2_spill] sm:$0xff] }
 0x232   :  { %6794 = vst [vmem:[#allocation4_spill] sm:$0xff] %v6717_v27  ;;  %v4383_v50 = vpop.f32.mrf.mxu0  ;;  %v3393_v27 = vadd.f32 %v4271_v55, %v3329_v33  ;;  %v3497_v26 = vadd.f32 %v4333_v34, %v3433_v22  ;;  %v4373_v55 = vadd.f32 %v4372_v52, %v4371_v25  ;;  %v3569_v53 = vadd.f32 %v4379_v21, %v3505_v29 }
 0x233   :  { %v4423_v57 = vpop.f32.mrf.mxu1  ;;  %v3572_v10 = vadd.f32 %v4382_v5, %v3508_v54 }
 0x234   :  { %v4384_v47 = vpop.f32.mrf.mxu0  ;;  %v3457_v60 = vadd.f32 %v4311_v39, %v3393_v27  ;;  %v3561_v25 = vadd.f32 %v4373_v55, %v3497_v26  ;;  %v6795_v27 = vld [vmem:[#allocation3_spill] sm:$0xff]  ;;  %v3633_v30 = vadd.f32 %v4419_v7, %v3569_v53 }
 0x235   :  { %v4424_v2 = vpop.f32.mrf.mxu1  ;;  %v4385_v1 = vadd.f32 %v4384_v47, %v4383_v50  ;;  %v4413_v32 = vadd.f32 %v6795_v27, %v6707_v48  ;;  %v6798_v48 = vld [vmem:[#allocation5_spill] sm:$0xff] }
 0x236   :  { %v4386_v35 = vpop.f32.mrf.mxu0  ;;  %v3521_v37 = vadd.f32 %v4351_v20, %v3457_v60  ;;  %v4425_v33 = vadd.f32 %v4424_v2, %v4423_v57  ;;  %v4416_v63 = vadd.f32 %v6799_v16, %v6798_v48 }
 0x237   :  { %v6723_v11 = vpop.f32.mrf.mxu1  ;;  %v3577_v52 = vadd.f32 %v4385_v1, %v3513_v0  ;;  %v6796_v8 = vld [vmem:[#allocation6_spill] sm:$0xff]  ;;  %v3625_v46 = vadd.f32 %v4413_v32, %v3561_v25 }
 0x238   :  { %v4387_v62 = vpop.f32.mrf.mxu0 }
 0x239   :  { %v4427_v14 = vpop.f32.mrf.mxu1  ;;  %v4388_v61 = vadd.f32 %v4387_v62, %v4386_v35  ;;  %v6797_v15 = vld [vmem:[#allocation4_spill] sm:$0xff]  ;;  %v3641_v18 = vadd.f32 %v4425_v33, %v3577_v52 }
 0x23a   :  { %v4389_v3 = vpop.f32.mrf.mxu0  ;;  %v4422_v28 = vadd.f32 %v6797_v15, %v6796_v8  ;;  %v4428_v2 = vadd.f32 %v4427_v14, %v6723_v11  ;;  %v3628_v14 = vadd.f32 %v4416_v63, %v3564_v31 }
 0x23b   :  { %v4429_v49 = vpop.f32.mrf.mxu1  ;;  %v3580_v47 = vadd.f32 %v4388_v61, %v3516_v36 }
 0x23c   :  { %v4390_v41 = vpop.f32.mrf.mxu0  ;;  %v3636_v12 = vadd.f32 %v4422_v28, %v3572_v10 }
 0x23d   :  { %v4430_v39 = vpop.f32.mrf.mxu1  ;;  %v4391_v24 = vadd.f32 %v4390_v41, %v4389_v3  ;;  %v3644_v26 = vadd.f32 %v4428_v2, %v3580_v47 }
 0x23e   :  { %v4392_v9 = vpop.f32.mrf.mxu0  ;;  %v4431_v22 = vadd.f32 %v4430_v39, %v4429_v49 }
 0x23f   :  { %v4432_v40 = vpop.f32.mrf.mxu1  ;;  %v3585_v38 = vadd.f32 %v4391_v24, %v3521_v37 }
 0x240   :  { %v4393_v50 = vpop.f32.mrf.mxu0 }
 0x241   :  { %v4433_v43 = vpop.f32.mrf.mxu1  ;;  %v3649_v13 = vadd.f32 %v4431_v22, %v3585_v38 }
 0x242   :  { %v4447_v59 = vpop.f32.mrf.mxu0 }
 0x243   :  { %v4451_v51 = vpop.f32.mrf.mxu1  ;;  %v3697_v35 = vadd.f32 %v4447_v59, %v3633_v30 }
 0x244   :  { %v3713_v34 = vadd.f32 %v4451_v51, %v3649_v13  ;;  %v3688_v17 = vpop.f32.mrf.mxu0 }
 0x245   :  { %v3704_v23 = vpop.f32.mrf.mxu1  ;;  %3727 = vst.msk [vmem:[%s6773_s2 + $0x40] sm:$0xff] %vm3720_vm1, %v3697_v35  ;;  %v3689_v57 = vadd.f32 %v3688_v17, %v3625_v46 }
 0x246   :  { %3740 = vst.msk [vmem:[%s6773_s2 + $0xa0] sm:$0x1] %vm3739_vm2, %v3713_v34  ;;  %v3705_v62 = vadd.f32 %v3704_v23, %v3641_v18  ;;  %v4448_v60 = vpop.f32.mrf.mxu0 }
 0x247   :  { %v4452_v21 = vpop.f32.mrf.mxu1  ;;  %3721 = vst.msk [vmem:[%s6773_s2 + $0x10] sm:$0xff] %vm3720_vm1, %v3689_v57  ;;  %v3700_v11 = vadd.f32 %v4448_v60, %v3636_v12 }
 0x248   :  { %3733 = vst.msk [vmem:[%s6773_s2 + $0x70] sm:$0xff] %vm3720_vm1, %v3705_v62  ;;  %v3691_v19 = vpop.f32.mrf.mxu0 }
 0x249   :  { %v3707_v45 = vpop.f32.mrf.mxu1  ;;  %3730 = vst.msk [vmem:[%s6773_s2 + $0x58] sm:$0xff] %vm3720_vm1, %v3700_v11  ;;  %v3692_v55 = vadd.f32 %v3691_v19, %v3628_v14 }
 0x24a   :  { %v3708_v3 = vadd.f32 %v3707_v45, %v3644_v26 }
 0x24b   :  { %3724 = vst.msk [vmem:[%s6773_s2 + $0x28] sm:$0xff] %vm3720_vm1, %v3692_v55 }
 0x24c   :  { %3736 = vst.msk [vmem:[%s6773_s2 + $0x88] sm:$0xff] %vm3720_vm1, %v3708_v3 }

</bundles_post_ra>
